<compile_context>
chip_gen: v7x
topology: tpu7x:2x2x1
jax: 0.10.0
libtpu: 0.0.40
codegen_flags: <defaults>
</compile_context>

<pallas_src>
import jax
import jax.numpy as jnp
from jax.experimental import pallas as pl
from jax.experimental.pallas import tpu as pltpu

LEAKY_SLOPE = 0.01     # nn.LeakyReLU() default negative_slope
BN_EPS = 1e-5          # nn.BatchNorm3d default eps


def _round_up(x, m):
    return (x + m - 1) // m * m


def _make_resblock_kernel(w_pad, cin, n_taps=27):
    """Kernel factory: w_pad = W+2 (padded width), cin = input channels."""

    def kernel(x0_ref, x1_ref, x2_ref, w_ref, o_ref, patch_ref):
        # x*_ref   : (1, 1, Sp, Cin)      bf16  padded (h,w)-plane slab at depth d+kd
        # w_ref    : (Kp, 2*Cout)         bf16  [BN-folded 3x3x3 conv | centre-tap skip],
        #                                       row K is the constant row (shift | b_skip)
        # o_ref    : (1, 1, Mrows, Cout)  bf16
        # patch_ref: (Mrows, Kp)          bf16  VMEM scratch: im2col tile built in VMEM
        mrows, kp = patch_ref.shape
        cout = o_ref.shape[-1]
        k = n_taps * cin
        x_refs = (x0_ref, x1_ref, x2_ref)

        # Tail of the patch tile: one constant-1 column (carries the folded BN
        # shift and skip bias through the matmul), zeros after it.  The scratch
        # is uninitialised and persists across grid steps, so refresh each step
        # (tiny (Mrows, Kp-K) store) to avoid NaN * 0 from stale VMEM.
        patch_ref[:, k:] = jnp.zeros((mrows, kp - k), patch_ref.dtype)
        patch_ref[:, k:k + 1] = jnp.ones((mrows, 1), patch_ref.dtype)

        # Build the (Mrows, 27*Cin) im2col tile with static row-shifted slices:
        # kd picks one of the three depth slabs; (kh, kw) is a static pl.ds row
        # shift of the flattened padded (h, w) plane.  Nothing touches HBM here.
        t = 0
        for kd in range(3):
            x_ref = x_refs[kd]
            for kh in range(3):
                for kw in range(3):
                    off = kh * w_pad + kw                      # static offset
                    patch_ref[:, t * cin:(t + 1) * cin] = (
                        x_ref[0, 0, pl.ds(off, mrows), :])
                    t += 1

        # One fused MXU matmul:
        #   columns [0, Cout)       -> BN-scale-folded 3x3x3 conv + BN shift
        #   columns [Cout, 2*Cout)  -> 1x1x1 skip conv + skip bias
        res = jnp.dot(patch_ref[...], w_ref[...],
                      preferred_element_type=jnp.float32)
        conv = res[:, :cout]
        skip = res[:, cout:]

        y = jnp.maximum(conv, LEAKY_SLOPE * conv)              # LeakyReLU
        # TODO(synk): Dropout is identity in eval mode; training-mode stochastic dropout not modeled.
        o_ref[0, 0, :, :] = (y + skip).astype(o_ref.dtype)

    return kernel


def resblock_forward(x_ncdhw, params):
    """x_ncdhw: (N, Cin, D, H, W) float32 (PyTorch layout). Returns (N, Cout, D, H, W)."""
    w_conv = params["w_conv"]        # (Cout, Cin, 3, 3, 3)   torch OIDHW
    w_skip = params["w_skip"]        # (Cout, Cin, 1, 1, 1)
    b_skip = params["b_skip"]        # (Cout,)

    N, Cin, D, H, W = x_ncdhw.shape
    Cout = w_conv.shape[0]
    assert Cin == w_conv.shape[1] and Cin == Cout == params["gamma"].shape[0], (
        "reference module's BatchNorm3d(channel_in) requires channel_in == channel_out")

    Wp = W + 2                       # padded width
    HWp = (H + 2) * Wp               # flattened padded (h, w) plane
    Mrows = H * Wp                   # output rows per (n, d) step (w-pad cols = garbage, dropped)
    Sp = _round_up(HWp + 2, 16)      # slab rows per depth slice (>= Mrows + max (kh,kw) offset)
    K = 27 * Cin                     # im2col contraction dim (27 taps x Cin)
    Kp = _round_up(K + 1, 128)       # + constant-1 column; lane-dense contraction dim

    # ---- layout plumbing: ONE channels-last zero-padded copy (no 27x im2col in HBM) ----
    x_cl = jnp.transpose(x_ncdhw, (0, 2, 3, 4, 1)).astype(jnp.bfloat16)      # (N, D, H, W, Cin)
    x_pad = jnp.pad(x_cl, ((0, 0), (1, 1), (1, 1), (1, 1), (0, 0)))           # (N, D+2, H+2, W+2, Cin)
    x_flat = x_pad.reshape(N, D + 2, HWp, Cin)
    x_flat = jnp.pad(x_flat, ((0, 0), (0, 0), (0, Sp - HWp), (0, 0)))         # halo rows for tap shifts

    # ---- fold BatchNorm (eval running stats) into the conv weights ----
    inv_std = jax.lax.rsqrt(params["running_var"].astype(jnp.float32) + BN_EPS)
    scale = params["gamma"] * inv_std                                         # (Cout,)
    shift = params["beta"] - params["running_mean"] * scale                   # (Cout,)

    # 3x3x3 conv weight -> (27*Cin, Cout), rows ordered (kd, kh, kw, ci); BN scale folded in f32.
    wc = jnp.transpose(w_conv, (2, 3, 4, 1, 0)).reshape(K, Cout) * scale[None, :]
    ws = jnp.transpose(w_skip[:, :, 0, 0, 0], (1, 0))                         # (Cin, Cout)
    ctr = 13 * Cin                                                            # centre tap (kd=kh=kw=1)

    w_big = jnp.zeros((Kp, 2 * Cout), jnp.float32)
    w_big = w_big.at[:K, :Cout].set(wc)
    w_big = w_big.at[K, :Cout].set(shift)            # BN shift (added pre-activation)
    w_big = w_big.at[ctr:ctr + Cin, Cout:].set(ws)   # 1x1x1 skip conv (centre tap rows only)
    w_big = w_big.at[K, Cout:].set(b_skip)           # skip-conv bias
    w_big = w_big.astype(jnp.bfloat16)

    kernel = _make_resblock_kernel(Wp, Cin)

    out = pl.pallas_call(
        kernel,
        out_shape=jax.ShapeDtypeStruct((N, D, Mrows, Cout), jnp.bfloat16),    # bf16 output stream
        grid=(N, D),
        in_specs=[
            # Three depth taps (kd = 0, 1, 2): depth block size 1 => the index_map value
            # d + kd is an element offset, so no shifted copies ever hit HBM.
            pl.BlockSpec((1, 1, Sp, Cin), (lambda n, d, kd=kd: (n, d + kd, 0, 0)))
            for kd in range(3)
        ] + [
            pl.BlockSpec((Kp, 2 * Cout), lambda n, d: (0, 0)),   # small resident fused weight
        ],
        out_specs=pl.BlockSpec((1, 1, Mrows, Cout), lambda n, d: (n, d, 0, 0)),
        scratch_shapes=[pltpu.VMEM((Mrows, Kp), jnp.bfloat16)],  # in-VMEM im2col tile
        compiler_params=pltpu.CompilerParams(
            # Both axes independent -> megacore can split the N*D (>= 2) steps across TCs.
            dimension_semantics=("parallel", "parallel"),
            vmem_limit_bytes=48 * 1024 * 1024,   # stay well under v7x's 64 MiB VMEM
        ),
    )(x_flat, x_flat, x_flat, w_big)

    # Drop the two garbage w-pad columns (only place they are ever consumed),
    # back to NCDHW, back to the caller's dtype.
    out = out.reshape(N, D, H, Wp, Cout)[:, :, :, :W, :]
    return jnp.transpose(out, (0, 4, 1, 2, 3)).astype(x_ncdhw.dtype)


def resblock_reference(x, params):
    """Pure-JAX f32 reference (NCDHW, eval-mode BN, identity dropout)."""
    hi = jax.lax.Precision.HIGHEST
    y = jax.lax.conv_general_dilated(
        x, params["w_conv"], window_strides=(1, 1, 1), padding=((1, 1),) * 3,
        dimension_numbers=("NCDHW", "OIDHW", "NCDHW"), precision=hi)
    inv = jax.lax.rsqrt(params["running_var"] + BN_EPS)
    scale = (params["gamma"] * inv)[None, :, None, None, None]
    shift = (params["beta"] - params["running_mean"] * params["gamma"] * inv)[
        None, :, None, None, None]
    y = y * scale + shift
    y = jnp.where(y > 0, y, LEAKY_SLOPE * y)
    skip = jax.lax.conv_general_dilated(
        x, params["w_skip"], window_strides=(1, 1, 1), padding=((0, 0),) * 3,
        dimension_numbers=("NCDHW", "OIDHW", "NCDHW"), precision=hi)
    skip = skip + params["b_skip"][None, :, None, None, None]
    return y + skip


if __name__ == "__main__":
    key = jax.random.PRNGKey(0)
    # channel_in == channel_out (required by the reference module's BN placement)
    N, C, D, H, W = 2, 4, 8, 8, 8
    ks = jax.random.split(key, 8)
    x = jax.random.normal(ks[0], (N, C, D, H, W), jnp.float32)

    params = {
        "w_conv":       0.1 * jax.random.normal(ks[1], (C, C, 3, 3, 3), jnp.float32),
        "w_skip":       0.1 * jax.random.normal(ks[2], (C, C, 1, 1, 1), jnp.float32),
        "b_skip":       0.1 * jax.random.normal(ks[3], (C,), jnp.float32),
        "gamma":        1.0 + 0.1 * jax.random.normal(ks[4], (C,), jnp.float32),
        "beta":         0.1 * jax.random.normal(ks[5], (C,), jnp.float32),
        "running_mean": 0.1 * jax.random.normal(ks[6], (C,), jnp.float32),
        "running_var":  1.0 + 0.1 * jax.random.uniform(ks[7], (C,), jnp.float32),
    }

    out = resblock_forward(x, params)
    jax.block_until_ready(out)

    ref = resblock_reference(x, params)
    max_err = float(jnp.max(jnp.abs(out - ref)))
    assert out.shape == (N, C, D, H, W), out.shape
    # Tolerance accounts for bf16 patch/weight casts and the bf16 output stream
    # (accumulation and epilogue stay f32).
    assert jnp.allclose(out, ref, atol=4e-2, rtol=4e-2), max_err

    print("KERNEL_OK")
</pallas_src>

<mosaic_0001>
module attributes {stable_mosaic.version = 11 : i64} {
  func.func @kernel(%arg0: i32, %arg1: i32, %arg2: memref<1x1x112x4xbf16, #tpu.memory_space<vmem>>, %arg3: memref<1x1x112x4xbf16, #tpu.memory_space<vmem>>, %arg4: memref<1x1x112x4xbf16, #tpu.memory_space<vmem>>, %arg5: memref<128x8xbf16, #tpu.memory_space<vmem>>, %arg6: memref<1x1x80x4xbf16, #tpu.memory_space<vmem>>, %arg7: memref<80x128xbf16, #tpu.memory_space<vmem>>) attributes {dimension_semantics = [#tpu.dimension_semantics<parallel>, #tpu.dimension_semantics<parallel>], iteration_bounds = array<i64: 2, 8>, scalar_prefetch = 0 : i64, scratch_operands = 1 : i64, tpu.core_type = #tpu.core_type<tc>, window_params = [{transform_indices = @transform_0, window_bounds = array<i64: 1, 1, 112, 4>}, {transform_indices = @transform_1, window_bounds = array<i64: 1, 1, 112, 4>}, {transform_indices = @transform_2, window_bounds = array<i64: 1, 1, 112, 4>}, {pipeline_mode = #tpu.pipeline_mode<synchronous>, transform_indices = @transform_3, window_bounds = array<i64: 128, 8>}, {transform_indices = @transform_4, window_bounds = array<i64: 1, 1, 80, 4>}]} {
    %cst = arith.constant 0.000000e+00 : bf16
    %0 = vector.broadcast %cst : bf16 to vector<80x20xbf16>
    %c0 = arith.constant 0 : index
    %c108 = arith.constant 108 : index
    %1 = vector.load %arg7[%c0, %c108] : memref<80x128xbf16, #tpu.memory_space<vmem>>, vector<80x20xbf16>
    tpu.vector_store %arg7[%c0, %c108], %0 {strides = array<i32>} : memref<80x128xbf16, #tpu.memory_space<vmem>>, vector<80x20xbf16>,
    %cst_0 = arith.constant 1.000000e+00 : bf16
    %2 = vector.broadcast %cst_0 : bf16 to vector<80x1xbf16>
    %c0_1 = arith.constant 0 : index
    %c108_2 = arith.constant 108 : index
    %3 = vector.load %arg7[%c0_1, %c108_2] : memref<80x128xbf16, #tpu.memory_space<vmem>>, vector<80x1xbf16>
    tpu.vector_store %arg7[%c0_1, %c108_2], %2 {strides = array<i32>} : memref<80x128xbf16, #tpu.memory_space<vmem>>, vector<80x1xbf16>,
    %c0_3 = arith.constant 0 : index
    %c0_4 = arith.constant 0 : index
    %c0_5 = arith.constant 0 : index
    %c0_6 = arith.constant 0 : index
    %4 = vector.load %arg2[%c0_3, %c0_4, %c0_5, %c0_6] : memref<1x1x112x4xbf16, #tpu.memory_space<vmem>>, vector<1x1x80x4xbf16>
    %5 = vector.shape_cast %4 : vector<1x1x80x4xbf16> to vector<80x4xbf16>
    %c0_7 = arith.constant 0 : index
    %c0_8 = arith.constant 0 : index
    %6 = vector.load %arg7[%c0_7, %c0_8] : memref<80x128xbf16, #tpu.memory_space<vmem>>, vector<80x4xbf16>
    tpu.vector_store %arg7[%c0_7, %c0_8], %5 {strides = array<i32>} : memref<80x128xbf16, #tpu.memory_space<vmem>>, vector<80x4xbf16>,
    %c0_9 = arith.constant 0 : index
    %c0_10 = arith.constant 0 : index
    %c1 = arith.constant 1 : index
    %c0_11 = arith.constant 0 : index
    %7 = vector.load %arg2[%c0_9, %c0_10, %c1, %c0_11] : memref<1x1x112x4xbf16, #tpu.memory_space<vmem>>, vector<1x1x80x4xbf16>
    %8 = vector.shape_cast %7 : vector<1x1x80x4xbf16> to vector<80x4xbf16>
    %c0_12 = arith.constant 0 : index
    %c4 = arith.constant 4 : index
    %9 = vector.load %arg7[%c0_12, %c4] : memref<80x128xbf16, #tpu.memory_space<vmem>>, vector<80x4xbf16>
    tpu.vector_store %arg7[%c0_12, %c4], %8 {strides = array<i32>} : memref<80x128xbf16, #tpu.memory_space<vmem>>, vector<80x4xbf16>,
    %c0_13 = arith.constant 0 : index
    %c0_14 = arith.constant 0 : index
    %c2 = arith.constant 2 : index
    %c0_15 = arith.constant 0 : index
    %10 = vector.load %arg2[%c0_13, %c0_14, %c2, %c0_15] : memref<1x1x112x4xbf16, #tpu.memory_space<vmem>>, vector<1x1x80x4xbf16>
    %11 = vector.shape_cast %10 : vector<1x1x80x4xbf16> to vector<80x4xbf16>
    %c0_16 = arith.constant 0 : index
    %c8 = arith.constant 8 : index
    %12 = vector.load %arg7[%c0_16, %c8] : memref<80x128xbf16, #tpu.memory_space<vmem>>, vector<80x4xbf16>
    tpu.vector_store %arg7[%c0_16, %c8], %11 {strides = array<i32>} : memref<80x128xbf16, #tpu.memory_space<vmem>>, vector<80x4xbf16>,
    %c0_17 = arith.constant 0 : index
    %c0_18 = arith.constant 0 : index
    %c10 = arith.constant 10 : index
    %c0_19 = arith.constant 0 : index
    %13 = vector.load %arg2[%c0_17, %c0_18, %c10, %c0_19] : memref<1x1x112x4xbf16, #tpu.memory_space<vmem>>, vector<1x1x80x4xbf16>
    %14 = vector.shape_cast %13 : vector<1x1x80x4xbf16> to vector<80x4xbf16>
    %c0_20 = arith.constant 0 : index
    %c12 = arith.constant 12 : index
    %15 = vector.load %arg7[%c0_20, %c12] : memref<80x128xbf16, #tpu.memory_space<vmem>>, vector<80x4xbf16>
    tpu.vector_store %arg7[%c0_20, %c12], %14 {strides = array<i32>} : memref<80x128xbf16, #tpu.memory_space<vmem>>, vector<80x4xbf16>,
    %c0_21 = arith.constant 0 : index
    %c0_22 = arith.constant 0 : index
    %c11 = arith.constant 11 : index
    %c0_23 = arith.constant 0 : index
    %16 = vector.load %arg2[%c0_21, %c0_22, %c11, %c0_23] : memref<1x1x112x4xbf16, #tpu.memory_space<vmem>>, vector<1x1x80x4xbf16>
    %17 = vector.shape_cast %16 : vector<1x1x80x4xbf16> to vector<80x4xbf16>
    %c0_24 = arith.constant 0 : index
    %c16 = arith.constant 16 : index
    %18 = vector.load %arg7[%c0_24, %c16] : memref<80x128xbf16, #tpu.memory_space<vmem>>, vector<80x4xbf16>
    tpu.vector_store %arg7[%c0_24, %c16], %17 {strides = array<i32>} : memref<80x128xbf16, #tpu.memory_space<vmem>>, vector<80x4xbf16>,
    %c0_25 = arith.constant 0 : index
    %c0_26 = arith.constant 0 : index
    %c12_27 = arith.constant 12 : index
    %c0_28 = arith.constant 0 : index
    %19 = vector.load %arg2[%c0_25, %c0_26, %c12_27, %c0_28] : memref<1x1x112x4xbf16, #tpu.memory_space<vmem>>, vector<1x1x80x4xbf16>
    %20 = vector.shape_cast %19 : vector<1x1x80x4xbf16> to vector<80x4xbf16>
    %c0_29 = arith.constant 0 : index
    %c20 = arith.constant 20 : index
    %21 = vector.load %arg7[%c0_29, %c20] : memref<80x128xbf16, #tpu.memory_space<vmem>>, vector<80x4xbf16>
    tpu.vector_store %arg7[%c0_29, %c20], %20 {strides = array<i32>} : memref<80x128xbf16, #tpu.memory_space<vmem>>, vector<80x4xbf16>,
    %c0_30 = arith.constant 0 : index
    %c0_31 = arith.constant 0 : index
    %c20_32 = arith.constant 20 : index
    %c0_33 = arith.constant 0 : index
    %22 = vector.load %arg2[%c0_30, %c0_31, %c20_32, %c0_33] : memref<1x1x112x4xbf16, #tpu.memory_space<vmem>>, vector<1x1x80x4xbf16>
    %23 = vector.shape_cast %22 : vector<1x1x80x4xbf16> to vector<80x4xbf16>
    %c0_34 = arith.constant 0 : index
    %c24 = arith.constant 24 : index
    %24 = vector.load %arg7[%c0_34, %c24] : memref<80x128xbf16, #tpu.memory_space<vmem>>, vector<80x4xbf16>
    tpu.vector_store %arg7[%c0_34, %c24], %23 {strides = array<i32>} : memref<80x128xbf16, #tpu.memory_space<vmem>>, vector<80x4xbf16>,
    %c0_35 = arith.constant 0 : index
    %c0_36 = arith.constant 0 : index
    %c21 = arith.constant 21 : index
    %c0_37 = arith.constant 0 : index
    %25 = vector.load %arg2[%c0_35, %c0_36, %c21, %c0_37] : memref<1x1x112x4xbf16, #tpu.memory_space<vmem>>, vector<1x1x80x4xbf16>
    %26 = vector.shape_cast %25 : vector<1x1x80x4xbf16> to vector<80x4xbf16>
    %c0_38 = arith.constant 0 : index
    %c28 = arith.constant 28 : index
    %27 = vector.load %arg7[%c0_38, %c28] : memref<80x128xbf16, #tpu.memory_space<vmem>>, vector<80x4xbf16>
    tpu.vector_store %arg7[%c0_38, %c28], %26 {strides = array<i32>} : memref<80x128xbf16, #tpu.memory_space<vmem>>, vector<80x4xbf16>,
    %c0_39 = arith.constant 0 : index
    %c0_40 = arith.constant 0 : index
    %c22 = arith.constant 22 : index
    %c0_41 = arith.constant 0 : index
    %28 = vector.load %arg2[%c0_39, %c0_40, %c22, %c0_41] : memref<1x1x112x4xbf16, #tpu.memory_space<vmem>>, vector<1x1x80x4xbf16>
    %29 = vector.shape_cast %28 : vector<1x1x80x4xbf16> to vector<80x4xbf16>
    %c0_42 = arith.constant 0 : index
    %c32 = arith.constant 32 : index
    %30 = vector.load %arg7[%c0_42, %c32] : memref<80x128xbf16, #tpu.memory_space<vmem>>, vector<80x4xbf16>
    tpu.vector_store %arg7[%c0_42, %c32], %29 {strides = array<i32>} : memref<80x128xbf16, #tpu.memory_space<vmem>>, vector<80x4xbf16>,
    %c0_43 = arith.constant 0 : index
    %c0_44 = arith.constant 0 : index
    %c0_45 = arith.constant 0 : index
    %c0_46 = arith.constant 0 : index
    %31 = vector.load %arg3[%c0_43, %c0_44, %c0_45, %c0_46] : memref<1x1x112x4xbf16, #tpu.memory_space<vmem>>, vector<1x1x80x4xbf16>
    %32 = vector.shape_cast %31 : vector<1x1x80x4xbf16> to vector<80x4xbf16>
    %c0_47 = arith.constant 0 : index
    %c36 = arith.constant 36 : index
    %33 = vector.load %arg7[%c0_47, %c36] : memref<80x128xbf16, #tpu.memory_space<vmem>>, vector<80x4xbf16>
    tpu.vector_store %arg7[%c0_47, %c36], %32 {strides = array<i32>} : memref<80x128xbf16, #tpu.memory_space<vmem>>, vector<80x4xbf16>,
    %c0_48 = arith.constant 0 : index
    %c0_49 = arith.constant 0 : index
    %c1_50 = arith.constant 1 : index
    %c0_51 = arith.constant 0 : index
    %34 = vector.load %arg3[%c0_48, %c0_49, %c1_50, %c0_51] : memref<1x1x112x4xbf16, #tpu.memory_space<vmem>>, vector<1x1x80x4xbf16>
    %35 = vector.shape_cast %34 : vector<1x1x80x4xbf16> to vector<80x4xbf16>
    %c0_52 = arith.constant 0 : index
    %c40 = arith.constant 40 : index
    %36 = vector.load %arg7[%c0_52, %c40] : memref<80x128xbf16, #tpu.memory_space<vmem>>, vector<80x4xbf16>
    tpu.vector_store %arg7[%c0_52, %c40], %35 {strides = array<i32>} : memref<80x128xbf16, #tpu.memory_space<vmem>>, vector<80x4xbf16>,
    %c0_53 = arith.constant 0 : index
    %c0_54 = arith.constant 0 : index
    %c2_55 = arith.constant 2 : index
    %c0_56 = arith.constant 0 : index
    %37 = vector.load %arg3[%c0_53, %c0_54, %c2_55, %c0_56] : memref<1x1x112x4xbf16, #tpu.memory_space<vmem>>, vector<1x1x80x4xbf16>
    %38 = vector.shape_cast %37 : vector<1x1x80x4xbf16> to vector<80x4xbf16>
    %c0_57 = arith.constant 0 : index
    %c44 = arith.constant 44 : index
    %39 = vector.load %arg7[%c0_57, %c44] : memref<80x128xbf16, #tpu.memory_space<vmem>>, vector<80x4xbf16>
    tpu.vector_store %arg7[%c0_57, %c44], %38 {strides = array<i32>} : memref<80x128xbf16, #tpu.memory_space<vmem>>, vector<80x4xbf16>,
    %c0_58 = arith.constant 0 : index
    %c0_59 = arith.constant 0 : index
    %c10_60 = arith.constant 10 : index
    %c0_61 = arith.constant 0 : index
    %40 = vector.load %arg3[%c0_58, %c0_59, %c10_60, %c0_61] : memref<1x1x112x4xbf16, #tpu.memory_space<vmem>>, vector<1x1x80x4xbf16>
    %41 = vector.shape_cast %40 : vector<1x1x80x4xbf16> to vector<80x4xbf16>
    %c0_62 = arith.constant 0 : index
    %c48 = arith.constant 48 : index
    %42 = vector.load %arg7[%c0_62, %c48] : memref<80x128xbf16, #tpu.memory_space<vmem>>, vector<80x4xbf16>
    tpu.vector_store %arg7[%c0_62, %c48], %41 {strides = array<i32>} : memref<80x128xbf16, #tpu.memory_space<vmem>>, vector<80x4xbf16>,
    %c0_63 = arith.constant 0 : index
    %c0_64 = arith.constant 0 : index
    %c11_65 = arith.constant 11 : index
    %c0_66 = arith.constant 0 : index
    %43 = vector.load %arg3[%c0_63, %c0_64, %c11_65, %c0_66] : memref<1x1x112x4xbf16, #tpu.memory_space<vmem>>, vector<1x1x80x4xbf16>
    %44 = vector.shape_cast %43 : vector<1x1x80x4xbf16> to vector<80x4xbf16>
    %c0_67 = arith.constant 0 : index
    %c52 = arith.constant 52 : index
    %45 = vector.load %arg7[%c0_67, %c52] : memref<80x128xbf16, #tpu.memory_space<vmem>>, vector<80x4xbf16>
    tpu.vector_store %arg7[%c0_67, %c52], %44 {strides = array<i32>} : memref<80x128xbf16, #tpu.memory_space<vmem>>, vector<80x4xbf16>,
    %c0_68 = arith.constant 0 : index
    %c0_69 = arith.constant 0 : index
    %c12_70 = arith.constant 12 : index
    %c0_71 = arith.constant 0 : index
    %46 = vector.load %arg3[%c0_68, %c0_69, %c12_70, %c0_71] : memref<1x1x112x4xbf16, #tpu.memory_space<vmem>>, vector<1x1x80x4xbf16>
    %47 = vector.shape_cast %46 : vector<1x1x80x4xbf16> to vector<80x4xbf16>
    %c0_72 = arith.constant 0 : index
    %c56 = arith.constant 56 : index
    %48 = vector.load %arg7[%c0_72, %c56] : memref<80x128xbf16, #tpu.memory_space<vmem>>, vector<80x4xbf16>
    tpu.vector_store %arg7[%c0_72, %c56], %47 {strides = array<i32>} : memref<80x128xbf16, #tpu.memory_space<vmem>>, vector<80x4xbf16>,
    %c0_73 = arith.constant 0 : index
    %c0_74 = arith.constant 0 : index
    %c20_75 = arith.constant 20 : index
    %c0_76 = arith.constant 0 : index
    %49 = vector.load %arg3[%c0_73, %c0_74, %c20_75, %c0_76] : memref<1x1x112x4xbf16, #tpu.memory_space<vmem>>, vector<1x1x80x4xbf16>
    %50 = vector.shape_cast %49 : vector<1x1x80x4xbf16> to vector<80x4xbf16>
    %c0_77 = arith.constant 0 : index
    %c60 = arith.constant 60 : index
    %51 = vector.load %arg7[%c0_77, %c60] : memref<80x128xbf16, #tpu.memory_space<vmem>>, vector<80x4xbf16>
    tpu.vector_store %arg7[%c0_77, %c60], %50 {strides = array<i32>} : memref<80x128xbf16, #tpu.memory_space<vmem>>, vector<80x4xbf16>,
    %c0_78 = arith.constant 0 : index
    %c0_79 = arith.constant 0 : index
    %c21_80 = arith.constant 21 : index
    %c0_81 = arith.constant 0 : index
    %52 = vector.load %arg3[%c0_78, %c0_79, %c21_80, %c0_81] : memref<1x1x112x4xbf16, #tpu.memory_space<vmem>>, vector<1x1x80x4xbf16>
    %53 = vector.shape_cast %52 : vector<1x1x80x4xbf16> to vector<80x4xbf16>
    %c0_82 = arith.constant 0 : index
    %c64 = arith.constant 64 : index
    %54 = vector.load %arg7[%c0_82, %c64] : memref<80x128xbf16, #tpu.memory_space<vmem>>, vector<80x4xbf16>
    tpu.vector_store %arg7[%c0_82, %c64], %53 {strides = array<i32>} : memref<80x128xbf16, #tpu.memory_space<vmem>>, vector<80x4xbf16>,
    %c0_83 = arith.constant 0 : index
    %c0_84 = arith.constant 0 : index
    %c22_85 = arith.constant 22 : index
    %c0_86 = arith.constant 0 : index
    %55 = vector.load %arg3[%c0_83, %c0_84, %c22_85, %c0_86] : memref<1x1x112x4xbf16, #tpu.memory_space<vmem>>, vector<1x1x80x4xbf16>
    %56 = vector.shape_cast %55 : vector<1x1x80x4xbf16> to vector<80x4xbf16>
    %c0_87 = arith.constant 0 : index
    %c68 = arith.constant 68 : index
    %57 = vector.load %arg7[%c0_87, %c68] : memref<80x128xbf16, #tpu.memory_space<vmem>>, vector<80x4xbf16>
    tpu.vector_store %arg7[%c0_87, %c68], %56 {strides = array<i32>} : memref<80x128xbf16, #tpu.memory_space<vmem>>, vector<80x4xbf16>,
    %c0_88 = arith.constant 0 : index
    %c0_89 = arith.constant 0 : index
    %c0_90 = arith.constant 0 : index
    %c0_91 = arith.constant 0 : index
    %58 = vector.load %arg4[%c0_88, %c0_89, %c0_90, %c0_91] : memref<1x1x112x4xbf16, #tpu.memory_space<vmem>>, vector<1x1x80x4xbf16>
    %59 = vector.shape_cast %58 : vector<1x1x80x4xbf16> to vector<80x4xbf16>
    %c0_92 = arith.constant 0 : index
    %c72 = arith.constant 72 : index
    %60 = vector.load %arg7[%c0_92, %c72] : memref<80x128xbf16, #tpu.memory_space<vmem>>, vector<80x4xbf16>
    tpu.vector_store %arg7[%c0_92, %c72], %59 {strides = array<i32>} : memref<80x128xbf16, #tpu.memory_space<vmem>>, vector<80x4xbf16>,
    %c0_93 = arith.constant 0 : index
    %c0_94 = arith.constant 0 : index
    %c1_95 = arith.constant 1 : index
    %c0_96 = arith.constant 0 : index
    %61 = vector.load %arg4[%c0_93, %c0_94, %c1_95, %c0_96] : memref<1x1x112x4xbf16, #tpu.memory_space<vmem>>, vector<1x1x80x4xbf16>
    %62 = vector.shape_cast %61 : vector<1x1x80x4xbf16> to vector<80x4xbf16>
    %c0_97 = arith.constant 0 : index
    %c76 = arith.constant 76 : index
    %63 = vector.load %arg7[%c0_97, %c76] : memref<80x128xbf16, #tpu.memory_space<vmem>>, vector<80x4xbf16>
    tpu.vector_store %arg7[%c0_97, %c76], %62 {strides = array<i32>} : memref<80x128xbf16, #tpu.memory_space<vmem>>, vector<80x4xbf16>,
    %c0_98 = arith.constant 0 : index
    %c0_99 = arith.constant 0 : index
    %c2_100 = arith.constant 2 : index
    %c0_101 = arith.constant 0 : index
    %64 = vector.load %arg4[%c0_98, %c0_99, %c2_100, %c0_101] : memref<1x1x112x4xbf16, #tpu.memory_space<vmem>>, vector<1x1x80x4xbf16>
    %65 = vector.shape_cast %64 : vector<1x1x80x4xbf16> to vector<80x4xbf16>
    %c0_102 = arith.constant 0 : index
    %c80 = arith.constant 80 : index
    %66 = vector.load %arg7[%c0_102, %c80] : memref<80x128xbf16, #tpu.memory_space<vmem>>, vector<80x4xbf16>
    tpu.vector_store %arg7[%c0_102, %c80], %65 {strides = array<i32>} : memref<80x128xbf16, #tpu.memory_space<vmem>>, vector<80x4xbf16>,
    %c0_103 = arith.constant 0 : index
    %c0_104 = arith.constant 0 : index
    %c10_105 = arith.constant 10 : index
    %c0_106 = arith.constant 0 : index
    %67 = vector.load %arg4[%c0_103, %c0_104, %c10_105, %c0_106] : memref<1x1x112x4xbf16, #tpu.memory_space<vmem>>, vector<1x1x80x4xbf16>
    %68 = vector.shape_cast %67 : vector<1x1x80x4xbf16> to vector<80x4xbf16>
    %c0_107 = arith.constant 0 : index
    %c84 = arith.constant 84 : index
    %69 = vector.load %arg7[%c0_107, %c84] : memref<80x128xbf16, #tpu.memory_space<vmem>>, vector<80x4xbf16>
    tpu.vector_store %arg7[%c0_107, %c84], %68 {strides = array<i32>} : memref<80x128xbf16, #tpu.memory_space<vmem>>, vector<80x4xbf16>,
    %c0_108 = arith.constant 0 : index
    %c0_109 = arith.constant 0 : index
    %c11_110 = arith.constant 11 : index
    %c0_111 = arith.constant 0 : index
    %70 = vector.load %arg4[%c0_108, %c0_109, %c11_110, %c0_111] : memref<1x1x112x4xbf16, #tpu.memory_space<vmem>>, vector<1x1x80x4xbf16>
    %71 = vector.shape_cast %70 : vector<1x1x80x4xbf16> to vector<80x4xbf16>
    %c0_112 = arith.constant 0 : index
    %c88 = arith.constant 88 : index
    %72 = vector.load %arg7[%c0_112, %c88] : memref<80x128xbf16, #tpu.memory_space<vmem>>, vector<80x4xbf16>
    tpu.vector_store %arg7[%c0_112, %c88], %71 {strides = array<i32>} : memref<80x128xbf16, #tpu.memory_space<vmem>>, vector<80x4xbf16>,
    %c0_113 = arith.constant 0 : index
    %c0_114 = arith.constant 0 : index
    %c12_115 = arith.constant 12 : index
    %c0_116 = arith.constant 0 : index
    %73 = vector.load %arg4[%c0_113, %c0_114, %c12_115, %c0_116] : memref<1x1x112x4xbf16, #tpu.memory_space<vmem>>, vector<1x1x80x4xbf16>
    %74 = vector.shape_cast %73 : vector<1x1x80x4xbf16> to vector<80x4xbf16>
    %c0_117 = arith.constant 0 : index
    %c92 = arith.constant 92 : index
    %75 = vector.load %arg7[%c0_117, %c92] : memref<80x128xbf16, #tpu.memory_space<vmem>>, vector<80x4xbf16>
    tpu.vector_store %arg7[%c0_117, %c92], %74 {strides = array<i32>} : memref<80x128xbf16, #tpu.memory_space<vmem>>, vector<80x4xbf16>,
    %c0_118 = arith.constant 0 : index
    %c0_119 = arith.constant 0 : index
    %c20_120 = arith.constant 20 : index
    %c0_121 = arith.constant 0 : index
    %76 = vector.load %arg4[%c0_118, %c0_119, %c20_120, %c0_121] : memref<1x1x112x4xbf16, #tpu.memory_space<vmem>>, vector<1x1x80x4xbf16>
    %77 = vector.shape_cast %76 : vector<1x1x80x4xbf16> to vector<80x4xbf16>
    %c0_122 = arith.constant 0 : index
    %c96 = arith.constant 96 : index
    %78 = vector.load %arg7[%c0_122, %c96] : memref<80x128xbf16, #tpu.memory_space<vmem>>, vector<80x4xbf16>
    tpu.vector_store %arg7[%c0_122, %c96], %77 {strides = array<i32>} : memref<80x128xbf16, #tpu.memory_space<vmem>>, vector<80x4xbf16>,
    %c0_123 = arith.constant 0 : index
    %c0_124 = arith.constant 0 : index
    %c21_125 = arith.constant 21 : index
    %c0_126 = arith.constant 0 : index
    %79 = vector.load %arg4[%c0_123, %c0_124, %c21_125, %c0_126] : memref<1x1x112x4xbf16, #tpu.memory_space<vmem>>, vector<1x1x80x4xbf16>
    %80 = vector.shape_cast %79 : vector<1x1x80x4xbf16> to vector<80x4xbf16>
    %c0_127 = arith.constant 0 : index
    %c100 = arith.constant 100 : index
    %81 = vector.load %arg7[%c0_127, %c100] : memref<80x128xbf16, #tpu.memory_space<vmem>>, vector<80x4xbf16>
    tpu.vector_store %arg7[%c0_127, %c100], %80 {strides = array<i32>} : memref<80x128xbf16, #tpu.memory_space<vmem>>, vector<80x4xbf16>,
    %c0_128 = arith.constant 0 : index
    %c0_129 = arith.constant 0 : index
    %c22_130 = arith.constant 22 : index
    %c0_131 = arith.constant 0 : index
    %82 = vector.load %arg4[%c0_128, %c0_129, %c22_130, %c0_131] : memref<1x1x112x4xbf16, #tpu.memory_space<vmem>>, vector<1x1x80x4xbf16>
    %83 = vector.shape_cast %82 : vector<1x1x80x4xbf16> to vector<80x4xbf16>
    %c0_132 = arith.constant 0 : index
    %c104 = arith.constant 104 : index
    %84 = vector.load %arg7[%c0_132, %c104] : memref<80x128xbf16, #tpu.memory_space<vmem>>, vector<80x4xbf16>
    tpu.vector_store %arg7[%c0_132, %c104], %83 {strides = array<i32>} : memref<80x128xbf16, #tpu.memory_space<vmem>>, vector<80x4xbf16>,
    %c0_133 = arith.constant 0 : index
    %c0_134 = arith.constant 0 : index
    %85 = vector.load %arg7[%c0_133, %c0_134] : memref<80x128xbf16, #tpu.memory_space<vmem>>, vector<80x128xbf16>
    %c0_135 = arith.constant 0 : index
    %c0_136 = arith.constant 0 : index
    %86 = vector.load %arg5[%c0_135, %c0_136] : memref<128x8xbf16, #tpu.memory_space<vmem>>, vector<128x8xbf16>
    %cst_137 = arith.constant dense<0.000000e+00> : vector<80x8xf32>
    %87 = tpu.matmul %85, %86, %cst_137 {dimension_numbers = #tpu.dot_dimension_numbers<[1], [0], [0], [1], [0, 0, 1, 1], [], []>} : vector<80x128xbf16>, vector<128x8xbf16>, vector<80x8xf32> -> vector<80x8xf32>
    %88 = vector.extract_strided_slice %87 {offsets = [0, 0], sizes = [80, 4], strides = [1, 1]} : vector<80x8xf32> to vector<80x4xf32>
    %89 = vector.extract_strided_slice %87 {offsets = [0, 4], sizes = [80, 4], strides = [1, 1]} : vector<80x8xf32> to vector<80x4xf32>
    %cst_138 = arith.constant 0.00999999977 : f32
    %90 = vector.broadcast %cst_138 : f32 to vector<80x4xf32>
    %91 = arith.mulf %90, %88 : vector<80x4xf32>
    %92 = arith.maximumf %88, %91 : vector<80x4xf32>
    %93 = arith.addf %92, %89 : vector<80x4xf32>
    %94 = arith.truncf %93 : vector<80x4xf32> to vector<80x4xbf16>
    %c0_139 = arith.constant 0 : index
    %c0_140 = arith.constant 0 : index
    %c0_141 = arith.constant 0 : index
    %c0_142 = arith.constant 0 : index
    %95 = vector.load %arg6[%c0_139, %c0_140, %c0_141, %c0_142] : memref<1x1x80x4xbf16, #tpu.memory_space<vmem>>, vector<1x1x80x4xbf16>
    %96 = vector.shape_cast %95 : vector<1x1x80x4xbf16> to vector<80x4xbf16>
    %97 = vector.shape_cast %94 : vector<80x4xbf16> to vector<1x1x80x4xbf16>
    tpu.vector_store %arg6[%c0_139, %c0_140, %c0_141, %c0_142], %97 {strides = array<i32>} : memref<1x1x80x4xbf16, #tpu.memory_space<vmem>>, vector<1x1x80x4xbf16>,
    return
  }
  func.func @transform_0(%arg0: i32, %arg1: i32) -> (i32, i32, i32, i32) {
    %c0_i32 = arith.constant 0 : i32
    %0 = arith.addi %arg1, %c0_i32 : i32
    %c0_i32_0 = arith.constant 0 : i32
    %c0_i32_1 = arith.constant 0 : i32
    %c0_i32_2 = arith.constant 0 : i32
    return %arg0, %0, %c0_i32_0, %c0_i32_1 : i32, i32, i32, i32
  }
  func.func @transform_1(%arg0: i32, %arg1: i32) -> (i32, i32, i32, i32) {
    %c1_i32 = arith.constant 1 : i32
    %0 = arith.addi %arg1, %c1_i32 : i32
    %c0_i32 = arith.constant 0 : i32
    %c0_i32_0 = arith.constant 0 : i32
    %c0_i32_1 = arith.constant 0 : i32
    return %arg0, %0, %c0_i32, %c0_i32_0 : i32, i32, i32, i32
  }
  func.func @transform_2(%arg0: i32, %arg1: i32) -> (i32, i32, i32, i32) {
    %c2_i32 = arith.constant 2 : i32
    %0 = arith.addi %arg1, %c2_i32 : i32
    %c0_i32 = arith.constant 0 : i32
    %c0_i32_0 = arith.constant 0 : i32
    %c0_i32_1 = arith.constant 0 : i32
    return %arg0, %0, %c0_i32, %c0_i32_0 : i32, i32, i32, i32
  }
  func.func @transform_3(%arg0: i32, %arg1: i32) -> (i32, i32) {
    %c0_i32 = arith.constant 0 : i32
    %c0_i32_0 = arith.constant 0 : i32
    %c0_i32_1 = arith.constant 0 : i32
    return %c0_i32, %c0_i32_0 : i32, i32
  }
  func.func @transform_4(%arg0: i32, %arg1: i32) -> (i32, i32, i32, i32) {
    %c0_i32 = arith.constant 0 : i32
    %c0_i32_0 = arith.constant 0 : i32
    %c0_i32_1 = arith.constant 0 : i32
    return %arg0, %arg1, %c0_i32, %c0_i32_0 : i32, i32, i32, i32
  }
}

</mosaic_0001>

<bundles_post_ra>
// kernel: tpu_custom_call.1
= control target key start
LH: loop header
LB: loop body
LE: loop exit
PB: predicated region body
PF: predicated region fallthrough
CT: control target
= control target key end

     0   :  { %s3552_s15 = smov 0   ;;  %s3554_s16 = smov 0   ;;  %s4858_s0 = inlined_call_operand.vmem [shape: bf16[2,10,112,4], index: 0, kind: input, shape index: {}]   ;;  %s4859_s1 = inlined_call_operand.vmem [shape: bf16[2,10,112,4], index: 1, kind: input, shape index: {}]   ;;  %s4860_s2 = inlined_call_operand.vmem [shape: bf16[2,10,112,4], index: 2, kind: input, shape index: {}]   ;;  %s4861_s3 = inlined_call_operand.vmem [shape: bf16[128,8], index: 3, kind: input, shape index: {}]   ;;  %s4862_s4 = inlined_call_operand.vmem [shape: bf16[2,8,80,4], index: 4, kind: output, shape index: {}]  }
   0x1   :  { %s3556_s17 = smov 0   ;;  %s3558_s18 = smov 0  }
   0x2   :  { %s3560_s19 = smov 0  }
   0x3 LB: > { %s23_s20 = sadd.s32 1, %s3486_s17  ;;  %s26_s21 = sadd.s32 1, %s3490_s18  ;;  %s3494_s19 = sphi %s3560_s19, %s14_s19   ;;  %s3490_s18 = sphi %s3558_s18, %s4937_s18   ;;  %s3486_s17 = sphi %s3556_s17, %s4936_s17   ;;  %s3482_s16 = sphi %s3554_s16, %s4935_s16   ;;  %s3478_s15 = sphi %s3552_s15, %s4934_s15  }
   0x4   : > { %p24_p0 = scmp.ge.s32.totalorder %s23_s20, 8  ;;  %p2953_p1 = scmp.ge.s32.totalorder %s3494_s19, 1 }
   0x5   : > { %p222_p2 = scmp.lt.s32.totalorder %s3494_s19, 17 }
   0x6   : > { %s4939_s20 = smov (%p24_p0, %s23_s20), 0  ;;  %s4941_s21 = smov (!%p24_p0, %s26_s21), %s3490_s18 }
   0x7   : > { %p223_p3 = pnand %p2953_p1, %p222_p2  ;;  %p28_p4 = scmp.ge.s32.totalorder %s4941_s21, 2 }
   0x8   : > { %p276_p5 = scmp.lt.s32.totalorder (!%p223_p3), %s3482_s16, 1  ;;  %p278_p6 = scmp.lt.s32.totalorder (!%p223_p3), %s3478_s15, 9  ;;  %vm520_vm0 = vcmask (!%p223_p3), 1046528   ;;  %vm777_vm1 = vcmask (!%p223_p3), 1045504   ;;  %vm1034_vm2 = vcmask (!%p223_p3), 1044480   ;;  %vm318_vm6 = vcmask (!%p223_p3), 1048416  }
   0x9   : > { %s4943_s21 = smov (%p28_p4, %s4941_s21), 0  ;;  %226 = sbr.rel (%p223_p3) target bundleno = 746 (0x2ea), region = 36 }
   0xa   : > { %s285_s30 = sadd.s32 (!%p223_p3), 1, %s3478_s15  ;;  %s3496_s5 = smov (!%p223_p3), 12   ;;  %vm415_vm3 = vsmask.f32 (!%p223_p3), 7424  ;;  %vm663_vm4 = vsmask.f32 (!%p223_p3), 6400 }
   0xb   : > { %p288_p7 = scmp.lt.s32.totalorder (!%p223_p3), %s285_s30, 9  ;;  %s3497_s6 = smov (!%p223_p3), 8   ;;  %vm920_vm5 = vsmask.f32 (!%p223_p3), 5376  ;;  %vm324_vm7 = vcmask (!%p223_p3), 892768   ;;  %vm370_vm8 = vcmask (!%p223_p3), 31744  }
   0xc   : > { %s3498_s7 = smov (!%p223_p3), 24   ;;  %s3499_s9 = smov (!%p223_p3), 20   ;;  %vm4877_vm9 = vcmask (!%p223_p3), 64544   ;;  %vm547_vm10 = vcmask (!%p223_p3), 97344   ;;  %vm618_vm11 = vcmask (!%p223_p3), 130144   ;;  %vm4882_vm12 = vcmask (!%p223_p3), 162944  }
   0xd   : > { %s4867_s10 = smov (!%p223_p3), 32   ;;  %s3501_s11 = smov (!%p223_p3), 4   ;;  %vm804_vm13 = vcmask (!%p223_p3), 195744   ;;  %vm875_vm14 = vcmask (!%p223_p3), 228544   ;;  %vm4884_vm15 = vcmask (!%p223_p3), 261344  }
   0xe   : > { %s3502_s13 = smov (!%p223_p3), 16   ;;  %s3504_s27 = smov (!%p223_p3), 36  }
   0xf   : > { %s3505_s28 = smov (!%p223_p3), 40   ;;  %p309_p9 = scmp.lt.s32.totalorder (!%p223_p3), %s3478_s15, 7 }
  0x10   : > { %s4945_s16 = smov (!%p276_p5, %s3482_s16), 1  ;;  %s4947_s30 = smov (!%p288_p7, %s285_s30), 9 }
  0x11   : > { %s279_s22 = scalar_select %p278_p6, %s3478_s15, 9 }
  0x12   : > { %s3589_s23 = smul.u32 140, %s4945_s16 }
  0x13   : > { %s3212_s24 = smul.u32 14, %s279_s22  ;;  %s4863_s22 = smov 60  }
  0x14   : > { %s3214_s8 = smul.u32 14, %s4947_s30  ;;  %s3506_s30 = smov 44  }
  0x15   : > { %s282_s25 = sadd.s32 %s3589_s23, %s3212_s24  ;;  %s4865_s24 = smov 64  }
  0x16   : > { %s2954_s26 = sshll.u32 %s282_s25, 2  ;;  %s292_s12 = sadd.s32 %s3214_s8, %s3589_s23 }
  0x17   : > { %s3595_s29 = scalar_lea.vmem %s4858_s0, %s2954_s26  ;;  %s2955_s14 = sshll.u32 %s292_s12, 2 }
  0x18   : > { %v3289_v0 = vld [vmem:[%s3595_s29 + $0x4] sm:$0xfe]   ;;  %v3600_v1 = vld [vmem:[%s3595_s29 + $0xc] sm:$0xff]   ;;  %v3305_v43 = vld [vmem:[%s3595_s29 + $0x18] sm:$0xff]   ;;  %s3691_s25 = scalar_lea.vmem %s4859_s1, %s2955_s14  ;;  %s4869_s26 = smov 28  }
  0x19   : > { %v592_v2 = vrot.slane %v3289_v0, 1  ;;  %v593_v3 = vrot.slane %v3600_v1, 1  ;;  %v3291_v4 = vld [vmem:[%s3595_s29] sm:$0xfe]   ;;  %v3605_v5 = vld [vmem:[%s3595_s29 + $0x8] sm:$0xff]   ;;  %v3613_v8 = vld [vmem:[%s3595_s29 + $0x10] sm:$0xff]  }
  0x1a   : > { %v521_v7 = vrot.slane %v3291_v4, 1  ;;  %v522_v9 = vrot.slane %v3605_v5, 1  ;;  %v3293_v10 = vld [vmem:[%s3595_s29 + $0x8] sm:$0xfc]   ;;  %v850_v12 = vrot.slane %v3613_v8, 2  ;;  %v3623_v13 = vld [vmem:[%s3595_s29 + $0x10] sm:$0xff]  }
  0x1b   : > { %v594_v6 = vsel %vm520_vm0, %v592_v2, %v593_v3  ;;  %v3619_v11 = vld [vmem:[%s3595_s29 + $0xc] sm:$0xff]   ;;  %v849_v15 = vrot.slane %v3293_v10, 2  ;;  %v3295_v16 = vld [vmem:[%s3595_s29 + $0x4] sm:$0xfc]   ;;  %v1036_v21 = vrot.slane %v3623_v13, 3  ;;  %v440_v56 = vshll.u32 %v3305_v43, 16 }
  0x1c   : > { %603 = vrot.lane.b32.xlu1 %v594_v6, %s3496_s5  ;;  %v523_v14 = vsel %vm520_vm0, %v521_v7, %v522_v9  ;;  %v779_v17 = vrot.slane %v3619_v11, 2  ;;  %v778_v19 = vrot.slane %v3295_v16, 2  ;;  %v3297_v20 = vld [vmem:[%s3595_s29 + $0x8] sm:$0xf8]   ;;  %v3299_v24 = vld [vmem:[%s3595_s29] sm:$0xff]   ;;  %v3304_v42 = vld [vmem:[%s3595_s29 + $0x10] sm:$0xff]  }
  0x1d   : > { %532 = vrot.lane.b32.xlu0 %v523_v14, %s3497_s6  ;;  %v851_v18 = vsel %vm777_vm1, %v849_v15, %v850_v12  ;;  %v1035_v23 = vrot.slane %v3297_v20, 3  ;;  %v3642_v25 = vld [vmem:[%s3595_s29 + $0x8] sm:$0xff]   ;;  %v417_v27 = vshrl.u32 %v3299_v24, 16  ;;  %v419_v28 = vshll.u32 %v3299_v24, 16  ;;  %v3661_v55 = vld [vmem:[%s3595_s29 + $0x20] sm:$0xff]   ;;  %v3667_v60 = vld [vmem:[%s3595_s29 + $0x10] sm:$0xff]  }
  0x1e   : > { %v780_v22 = vsel %vm777_vm1, %v778_v19, %v779_v17  ;;  %v424_v29 = vshll.u32 %v3642_v25, 16  ;;  %v3302_v30 = vld [vmem:[%s3595_s29 + $0xc] sm:$0xff]   ;;  %v3301_v31 = vld [vmem:[%s3595_s29 + $0x4] sm:$0xfe]   ;;  %v930_v50 = vshrl.u32 %v3304_v42, 16  ;;  %v933_v51 = vshll.u32 %v3304_v42, 16 }
  0x1f   : > { %v1037_v26 = vsel %vm1034_vm2, %v1035_v23, %v1036_v21  ;;  %v421_v32 = vrot.slane %v419_v28, 1  ;;  %v673_v34 = vshrl.u32 %v3302_v30, 16  ;;  %v676_v35 = vshll.u32 %v3302_v30, 16  ;;  %v3303_v38 = vld [vmem:[%s3595_s29 + $0x8] sm:$0xfc]   ;;  %v3680_v7 = vld [vmem:[%s3595_s29 + $0x10] sm:$0xff]  }
  0x20   : > { %860 = vrot.lane.b32.xlu1 %v851_v18, %s3498_s7  ;;  %v426_v33 = vrot.slane %v424_v29, 1  ;;  %v665_v36 = vshrl.u32 %v3301_v31, 16  ;;  %v668_v37 = vshll.u32 %v3301_v31, 16  ;;  %v922_v46 = vshrl.u32 %v3303_v38, 16  ;;  %v3683_v10 = vld [vmem:[%s3595_s29 + $0x18] sm:$0xff]   ;;  %v3713_v28 = vld [vmem:[%s3691_s25 + $0x8] sm:$0xff]  }
  0x21   : > { %789 = vrot.lane.b32.xlu0 %v780_v22, %s3499_s9  ;;  %v422_v39 = vor.u32 %v421_v32, %v417_v27  ;;  %v675_v40 = vrot.slane %v673_v34, 1  ;;  %v678_v41 = vrot.slane %v676_v35, 2  ;;  %v925_v47 = vshll.u32 %v3303_v38, 16  ;;  %v3309_v27 = vld [vmem:[%s3691_s25] sm:$0xff]   ;;  %s3507_s8 = smov 48   ;;  %s3508_s12 = smov 52  }
  0x22   : > { %v667_v44 = vrot.slane %v665_v36, 1  ;;  %v670_v45 = vrot.slane %v668_v37, 2  ;;  %v924_v53 = vrot.slane %v922_v46, 2  ;;  %v932_v57 = vrot.slane %v930_v50, 2  ;;  %v3716_v31 = vld [vmem:[%s3595_s29 + $0x20] sm:$0xff]   ;;  %v3730_v36 = vld [vmem:[%s3595_s29 + $0x14] sm:$0xff]  }
  0x23   : > { %v427_v48 = vsel %vm415_vm3, %v422_v39, %v426_v33  ;;  %v3657_v49 = vor.u32 %v678_v41, %v675_v40  ;;  %v927_v54 = vrot.slane %v925_v47, 3  ;;  %v935_v58 = vrot.slane %v933_v51, 3  ;;  %v3719_v32 = vld [vmem:[%s3595_s29 + $0x1c] sm:$0xff]   ;;  %v3724_v34 = vld [vmem:[%s3595_s29 + $0x24] sm:$0xff]   ;;  %v3317_v41 = vld [vmem:[%s3595_s29 + $0x14] sm:$0xff]   ;;  %s4871_s14 = smov 56  }
  0x24   : > { %1046 = vrot.lane.b32.xlu1 %v1037_v26, %s4867_s10  ;;  %v671_v52 = vor.u32 %v670_v45, %v667_v44  ;;  %v444_v59 = vshrl.u32 %v3305_v43, 16  ;;  %v3671_v63 = vrot.slane %v440_v56, 1  ;;  %v448_v0 = vshll.u32 %v3661_v55, 16  ;;  %v3318_v46 = vld [vmem:[%s3691_s25] sm:$0xfe]   ;;  %v3748_v47 = vld [vmem:[%s3691_s25 + $0x8] sm:$0xff]  }
  0x25   : > { %460 = vrot.lane.b32.xlu0 %v427_v48, %s3501_s11  ;;  %v928_v62 = vor.u32 %v927_v54, %v924_v53  ;;  %v3675_v2 = vor.u32 %v935_v58, %v932_v57  ;;  %v428_v4 = vshrl.u32 %v3642_v25, 16  ;;  %v432_v6 = vshll.u32 %v3667_v60, 16  ;;  %v3310_v25 = vld [vmem:[%s3691_s25] sm:$0xff]   ;;  %v3756_v53 = vld [vmem:[%s3691_s25 + $0xc] sm:$0xff]  }
  0x26   : > { %v680_v61 = vsel %vm663_vm4, %v671_v52, %v3657_v49  ;;  %v446_v14 = vor.u32 %v444_v59, %v3671_v63  ;;  %v3686_v15 = vrot.slane %v448_v0, 1  ;;  %v524_v20 = vrot.slane %v3680_v7, 1  ;;  %v3320_v56 = vld [vmem:[%s3691_s25 + $0x4] sm:$0xfe]   ;;  %v3322_v57 = vld [vmem:[%s3595_s29 + $0x1c] sm:$0xff]  }
  0x27   : > { %v937_v16 = vsel %vm920_vm5, %v928_v62, %v3675_v2  ;;  %v430_v18 = vor.u32 %v428_v4, %v426_v33  ;;  %v3695_v19 = vrot.slane %v432_v6, 1  ;;  %v526_v23 = vrot.slane %v3683_v10, 1  ;;  %v3323_v62 = vld [vmem:[%s3595_s29 + $0x24] sm:$0xff]  }
  0x28   : > { %717 = vrot.lane.b32.xlu1 %v680_v61, %s3502_s13  ;;  %v451_v22 = vsel %vm415_vm3, %v446_v14, %v3686_v15  ;;  %v525_v26 = vsel %vm520_vm0, %v522_v9, %v524_v20  ;;  %v1163_v29 = vshrl.u32 %v3310_v25, 16  ;;  %v1165_v30 = vshll.u32 %v3310_v25, 16 }
  0x29   : > { %974 = vrot.lane.b32.xlu0 %v937_v16, %s4869_s26  ;;  %v435_v24 = vsel %vm415_vm3, %v430_v18, %v3695_v19  ;;  %v1170_v33 = vshll.u32 %v3713_v28, 16  ;;  %v528_v9 = vrot.slane %v3716_v31, 1  ;;  %v597_v35 = vrot.slane %v3719_v32, 1  ;;  %v3324_v18 = vld [vmem:[%s3595_s29 + $0x1c] sm:$0xff]  }
  0x2a   : > { %v1167_v5 = vrot.slane %v1165_v30, 1  ;;  %v599_v38 = vrot.slane %v3724_v34, 1  ;;  %v595_v40 = vrot.slane %v3730_v36, 1  ;;  %v682_v44 = vshrl.u32 %v3317_v41, 16  ;;  %v3326_v30 = vld [vmem:[%s3595_s29 + $0x14] sm:$0xff]  }
  0x2b   : > { %v3732_v37 = vrot.slane %v1170_v33, 1  ;;  %v529_v43 = vsel %vm520_vm0, %v526_v23, %v528_v9  ;;  %v685_v45 = vshll.u32 %v3317_v41, 16  ;;  %v1266_v52 = vrot.slane %v3318_v46, 1  ;;  %v3794_v41 = vld [vmem:[%s3595_s29 + $0x18] sm:$0xff]   ;;  %v3803_v46 = vld [vmem:[%s3691_s25 + $0xc] sm:$0xff]  }
  0x2c   : > { %466 = vrot.lane.b32.xlu1 %v451_v22, %s3501_s11  ;;  %v1168_v39 = vor.u32 %v1167_v5, %v1163_v29  ;;  %v600_v48 = vsel %vm520_vm0, %v597_v35, %v599_v38  ;;  %v684_v50 = vrot.slane %v682_v44, 1  ;;  %v1267_v54 = vrot.slane %v3748_v47, 1  ;;  %v4021_v47 = vld [vmem:[%s3691_s25 + $0x24] sm:$0xff]  }
  0x2d   : > { %462 = vrot.lane.b32.xlu0 %v435_v24, %s3501_s11  ;;  %v687_v51 = vrot.slane %v685_v45, 2  ;;  %v596_v58 = vsel %vm520_vm0, %v593_v3, %v595_v40  ;;  %v1338_v61 = vrot.slane %v3756_v53, 1  ;;  %v1337_v0 = vrot.slane %v3320_v56, 1  ;;  %v3781_v24 = vld [vmem:[%s3595_s29 + $0x24] sm:$0xff]  }
  0x2e   : > { %v1173_v42 = vsel %vm415_vm3, %v1168_v39, %v3732_v37  ;;  %v691_v4 = vshrl.u32 %v3322_v57, 16  ;;  %v694_v14 = vshll.u32 %v3322_v57, 16  ;;  %v700_v16 = vshrl.u32 %v3323_v62, 16 }
  0x2f   : > { %v3767_v59 = vor.u32 %v687_v51, %v684_v50  ;;  %v703_v1 = vshll.u32 %v3323_v62, 16  ;;  %v1268_v3 = vsel %vm520_vm0, %v1266_v52, %v1267_v54  ;;  %v785_v29 = vrot.slane %v3781_v24, 2 }
  0x30   : > { %534 = vrot.lane.b32.xlu1 %v525_v26, %s3497_s6  ;;  %v693_v22 = vrot.slane %v691_v4, 1  ;;  %v696_v25 = vrot.slane %v694_v14, 2  ;;  %v702_v26 = vrot.slane %v700_v16, 1  ;;  %v1339_v33 = vsel %vm520_vm0, %v1337_v0, %v1338_v61  ;;  %v3330_v4 = vld [vmem:[%s3691_s25 + $0x4] sm:$0xfc]  }
  0x31   : > { %1102 = vrot.lane.b32.xlu0 %v3309_v27, %s3504_s27  ;;  %v689_v6 = vsel %vm663_vm4, %v3657_v49, %v3767_v59  ;;  %v705_v27 = vrot.slane %v703_v1, 2  ;;  %v783_v49 = vrot.slane %v3324_v18, 2  ;;  %v852_v45 = vrot.slane %v3794_v41, 2  ;;  %v3820_v16 = vld [vmem:[%s3595_s29 + $0x20] sm:$0xff]  }
  0x32   : > { %v3789_v5 = vor.u32 %v696_v25, %v693_v22  ;;  %v1522_v14 = vrot.slane %v3803_v46, 2  ;;  %v1521_v22 = vrot.slane %v3330_v4, 2  ;;  %v3826_v25 = vld [vmem:[%s3595_s29 + $0x28] sm:$0xff]  }
  0x33   : > { %v3791_v39 = vor.u32 %v705_v27, %v702_v26  ;;  %v786_v56 = vsel %vm777_vm1, %v783_v49, %v785_v29  ;;  %v853_v11 = vsel %vm777_vm1, %v850_v12, %v852_v45  ;;  %v3334_v26 = vld [vmem:[%s3595_s29 + $0x20] sm:$0xff]   ;;  %v3336_v12 = vld [vmem:[%s3595_s29 + $0x18] sm:$0xff]  }
  0x34   : > { %1206 = vrot.lane.b32.xlu1 %v1173_v42, %s3505_s28  ;;  %v781_v42 = vrot.slane %v3326_v30, 2  ;;  %v3335_v30 = vld [vmem:[%s3595_s29 + $0x28] sm:$0xff]  }
  0x35   : > { %538 = vrot.lane.b32.xlu0 %v529_v43, %s3497_s6  ;;  %v3329_v43 = vld [vmem:[%s3691_s25 + $0xc] sm:$0xff]   ;;  %v707_v44 = vsel %vm663_vm4, %v3789_v5, %v3791_v39  ;;  %v960_v8 = vshll.u32 %v3335_v30, 16 }
  0x36   : > { %v1417_v50 = vshrl.u32 %v3329_v43, 16  ;;  %v1420_v51 = vshll.u32 %v3329_v43, 16  ;;  %v3808_v52 = vsel %vm777_vm1, %v781_v42, %v783_v49  ;;  %v856_v49 = vrot.slane %v3826_v25, 2 }
  0x38   : > { %609 = vrot.lane.b32.xlu1 %v600_v48, %s3496_s5  ;;  %v3328_v48 = vld [vmem:[%s3691_s25 + $0x4] sm:$0xfe]   ;;  %v1419_v62 = vrot.slane %v1417_v50, 1  ;;  %v1422_v0 = vrot.slane %v1420_v51, 2  ;;  %v1523_v50 = vsel %vm777_vm1, %v1521_v22, %v1522_v14 }
  0x39   : > { %605 = vrot.lane.b32.xlu0 %v596_v58, %s3496_s5  ;;  %v1409_v57 = vshrl.u32 %v3328_v48, 16  ;;  %v1412_v58 = vshll.u32 %v3328_v48, 16  ;;  %v3337_v48 = vld [vmem:[%s3595_s29 + $0x18] sm:$0xff]  }
  0x3b   : > { %v1411_v1 = vrot.slane %v1409_v57, 1  ;;  %v1414_v18 = vrot.slane %v1412_v58, 2  ;;  %v962_v58 = vrot.slane %v960_v8, 3 }
  0x3c   : > { %719 = vrot.lane.b32.xlu1 %v689_v6, %s3502_s13  ;;  %v782_v6 = vsel %vm777_vm1, %v779_v17, %v781_v42  ;;  %v854_v17 = vrot.slane %v3820_v16, 2  ;;  %v951_v42 = vshll.u32 %v3334_v26, 16 }
  0x3d   : > { %1277 = vrot.lane.b32.xlu0 %v1268_v3, %s3506_s30  ;;  %v3823_v3 = vor.u32 %v1422_v0, %v1419_v62  ;;  %v1415_v27 = vor.u32 %v1414_v18, %v1411_v1  ;;  %v939_v62 = vshrl.u32 %v3336_v12, 16  ;;  %v942_v0 = vshll.u32 %v3336_v12, 16  ;;  %v3853_v18 = vld [vmem:[%s3691_s25 + $0x10] sm:$0xff]   ;;  %v3340_v12 = vld [vmem:[%s3691_s25 + $0x8] sm:$0xfc]  }
  0x3e   : > { %v857_v4 = vsel %vm777_vm1, %v854_v17, %v856_v49  ;;  %v1038_v1 = vrot.slane %v3337_v48, 3  ;;  %v3342_v48 = vld [vmem:[%s3595_s29 + $0x20] sm:$0xff]  }
  0x3f   : > { %v1424_v43 = vsel %vm663_vm4, %v1415_v27, %v3823_v3  ;;  %v3338_v27 = vld [vmem:[%s3691_s25 + $0x8] sm:$0xfc]   ;;  %v1040_v13 = vrot.slane %v3342_v48, 3 }
  0x40   : > { %1348 = vrot.lane.b32.xlu1 %v1339_v33, %s3507_s8  ;;  %v948_v33 = vshrl.u32 %v3334_v26, 16  ;;  %v944_v26 = vrot.slane %v942_v0, 3  ;;  %v1039_v8 = vsel %vm1034_vm2, %v1036_v21, %v1038_v1  ;;  %v3876_v0 = vld [vmem:[%s3595_s29 + $0x28] sm:$0xff]  }
  0x41   : > { %723 = vrot.lane.b32.xlu0 %v707_v44, %s3502_s13  ;;  %v957_v44 = vshrl.u32 %v3335_v30, 16  ;;  %v1593_v30 = vrot.slane %v3853_v18, 2 }
  0x42   : > { %v950_v51 = vrot.slane %v948_v33, 2 }
  0x43   : > { %v959_v57 = vrot.slane %v957_v44, 2  ;;  %v3341_v44 = vld [vmem:[%s3691_s25 + $0x10] sm:$0xff]  }
  0x44   : > { %795 = vrot.lane.b32.xlu1 %v786_v56, %s3499_s9  ;;  %v953_v56 = vrot.slane %v951_v42, 3 }
  0x45   : > { %791 = vrot.lane.b32.xlu0 %v782_v6, %s3499_s9  ;;  %v3856_v22 = vor.u32 %v962_v58, %v959_v57  ;;  %v1675_v57 = vshll.u32 %v3341_v44, 16  ;;  %v1664_v58 = vshrl.u32 %v3340_v12, 16 }
  0x46   : > { %v954_v6 = vor.u32 %v953_v56, %v950_v51  ;;  %v1672_v56 = vshrl.u32 %v3341_v44, 16  ;;  %v3344_v44 = vld [vmem:[%s3595_s29 + $0x28] ss:$0 sps:$4 sm:$0x11]  }
  0x48   : > { %862 = vrot.lane.b32.xlu1 %v853_v11, %s3498_s7  ;;  %v941_v11 = vrot.slane %v939_v62, 2  ;;  %v964_v33 = vsel %vm920_vm5, %v954_v6, %v3856_v22  ;;  %v1667_v62 = vshll.u32 %v3340_v12, 16  ;;  %v3887_v12 = vsel %vm1034_vm2, %v1038_v1, %v1040_v13 }
  0x49   : > { %1461 = vrot.lane.b32.xlu0 %v1424_v43, %s3508_s12  ;;  %v1592_v43 = vrot.slane %v3338_v27, 2  ;;  %v1666_v27 = vrot.slane %v1664_v58, 2  ;;  %v3910_v58 = vld [vmem:[%s3691_s25 + $0x10] sm:$0xff]  }
  0x4a   : > { %v945_v42 = vor.u32 %v944_v26, %v941_v11  ;;  %v1677_v11 = vrot.slane %v1675_v57, 3  ;;  %v436_v26 = vshrl.u32 %v3667_v60, 16  ;;  %v456_v60 = vshll.u32 %v3344_v44, 16  ;;  %v3347_v57 = vld [vmem:[%s3691_s25 + $0x8] sm:$0xf8]   ;;  %v3924_v44 = vld [vmem:[%s3691_s25 + $0x20] sm:$0xff]  }
  0x4b   : > { %v1594_v51 = vsel %vm777_vm1, %v1592_v43, %v1593_v30  ;;  %v1042_v43 = vrot.slane %v3876_v0, 3 }
  0x4c   : > { %1532 = vrot.lane.b32.xlu1 %v1523_v50, %s4871_s14  ;;  %v946_v50 = vsel %vm920_vm5, %v3675_v2, %v945_v42  ;;  %v3879_v21 = vsel %vm920_vm5, %v945_v42, %v954_v6  ;;  %v452_v2 = vshrl.u32 %v3661_v55, 16  ;;  %v458_v48 = vrot.slane %v456_v60, 1  ;;  %v3357_v60 = vld [vmem:[%s3691_s25 + $0x10] sm:$0xff]  }
  0x4d   : > { %866 = vrot.lane.b32.xlu0 %v857_v4, %s3498_s7  ;;  %v1674_v4 = vrot.slane %v1672_v56, 2  ;;  %v3345_v56 = vld [vmem:[%s3691_s25 + $0x18] sm:$0xff]   ;;  %v1269_v10 = vrot.slane %v3357_v60, 1 }
  0x4e   : > { %v454_v55 = vor.u32 %v452_v2, %v3686_v15  ;;  %v3902_v15 = vld [vmem:[%s3691_s25 + $0x10] sm:$0xff]   ;;  %v3346_v2 = vld [vmem:[%s3691_s25 + $0x8] sm:$0xff]  }
  0x4f   : > { %v3890_v6 = vor.u32 %v1677_v11, %v1674_v4  ;;  %v3350_v4 = vld [vmem:[%s3595_s29 + $0x28] ss:$0 sps:$4 sm:$0x11]   ;;  %v1174_v11 = vshrl.u32 %v3713_v28, 16  ;;  %v527_v28 = vsel %vm520_vm0, %v524_v20, %v526_v23  ;;  %v1194_v23 = vshll.u32 %v3924_v44, 16 }
  0x50   : > { %980 = vrot.lane.b32.xlu1 %v964_v33, %s4869_s26  ;;  %v1669_v33 = vrot.slane %v1667_v62, 3  ;;  %v1178_v62 = vshll.u32 %v3902_v15, 16 }
  0x51   : > { %976 = vrot.lane.b32.xlu0 %v946_v50, %s4869_s26  ;;  %v438_v50 = vor.u32 %v436_v26, %v3695_v19  ;;  %v3352_v19 = vld [vmem:[%s3691_s25 + $0x18] sm:$0xff]   ;;  %v1776_v26 = vrot.slane %v3347_v57, 3  ;;  %s3519_s26 = smov 88  }
  0x52   : > { %v1670_v42 = vor.u32 %v1669_v33, %v1666_v27  ;;  %v4876_v27 = vrot.slane %v3910_v58, 3  ;;  %v3355_v33 = vld [vmem:[%s3691_s25 + $0x18] sm:$0xff]  }
  0x54   : > { %1048 = vrot.lane.b32.xlu1 %v1039_v8, %s4867_s10  ;;  %v1679_v1 = vsel %vm920_vm5, %v1670_v42, %v3890_v6  ;;  %v1043_v8 = vsel %vm1034_vm2, %v1040_v13, %v1042_v43  ;;  %v443_v13 = vsel %vm415_vm3, %v438_v50, %v3671_v63  ;;  %v1186_v42 = vshll.u32 %v3352_v19, 16 }
  0x55   : > { %1603 = vrot.lane.b32.xlu0 %v1594_v51, %s4863_s22  ;;  %v459_v51 = vsel %vm415_vm3, %v454_v55, %v458_v48  ;;  %s296_s22 = sadd.s32 2, %s3478_s15  ;;  %v3927_v63 = vrot.slane %v1178_v62, 1  ;;  %v530_v55 = vrot.slane %v3350_v4, 1  ;;  %v1271_v48 = vrot.slane %v3355_v33, 1  ;;  %s4951_s15 = smov (!%p309_p9, %s3478_s15), 7 }
  0x56   : > { %p299_p8 = scmp.lt.s32.totalorder %s296_s22, 9  ;;  %v1778_v7 = vsel %vm1034_vm2, %v1776_v26, %v4876_v27  ;;  %v3946_v20 = vrot.slane %v1186_v42, 1  ;;  %v3966_v4 = vrot.slane %v1194_v23, 1  ;;  %v3972_v26 = vld [vmem:[%s3691_s25 + $0x1c] sm:$0xff]   ;;  %v4131_v27 = vld [vmem:[%s3691_s25 + $0x24] sm:$0xff]  }
  0x57   : > { %v531_v62 = vsel %vm520_vm0, %v528_v9, %v530_v55  ;;  %v1528_v46 = vrot.slane %v4131_v27, 2 }
  0x58   : > { %1716 = vrot.lane.b32.xlu1 %v1679_v1, %s4865_s24  ;;  %s4949_s22 = smov (!%p299_p8, %s296_s22), 9  ;;  %v1176_v1 = vor.u32 %v1174_v11, %v3732_v37  ;;  %v3951_v37 = vsel %vm520_vm0, %v1269_v10, %v1271_v48  ;;  %v3360_v11 = vld [vmem:[%s3691_s25 + $0x14] sm:$0xff]  }
  0x59   : > { %1052 = vrot.lane.b32.xlu0 %v1043_v8, %s4867_s10  ;;  %s3215_s24 = smul.u32 14, %s4949_s22  ;;  %v1190_v8 = vshrl.u32 %v3352_v19, 16  ;;  %v1340_v60 = vrot.slane %v3360_v11, 1  ;;  %v3369_v11 = vld [vmem:[%s3691_s25 + $0x14] sm:$0xff]   ;;  %s4878_s22 = smov 92  }
  0x5a   : > { %v1181_v50 = vsel %vm415_vm3, %v1176_v1, %v3927_v63  ;;  %v3367_v1 = vld [vmem:[%s3691_s25 + $0x1c] sm:$0xff]  }
  0x5b   : > { %s303_s10 = sadd.s32 %s3215_s24, %s3589_s23  ;;  %s3512_s23 = smov 68  }
  0x5c   : > { %468 = vrot.lane.b32.xlu1 %v459_v51, %s3501_s11  ;;  %v3354_v51 = vld [vmem:[%s3595_s29 + $0x2c] ss:$0 sps:$4 sm:$0x11]   ;;  %s4893_s24 = smov 60  }
  0x5d   : > { %464 = vrot.lane.b32.xlu0 %v443_v13, %s3501_s11  ;;  %s2956_s11 = sshll.u32 %s303_s10, 2  ;;  %v1192_v13 = vor.u32 %v1190_v8, %v3946_v20  ;;  %v601_v33 = vrot.slane %v3354_v51, 1  ;;  %s3513_s10 = smov 72   ;;  %v598_v51 = vsel %vm520_vm0, %v595_v40, %v597_v35 }
  0x5e   : > { %s3941_s14 = scalar_lea.vmem %s4860_s2, %s2956_s11  ;;  %s4894_s11 = smov 32  }
  0x5f   : > { %v3358_v57 = vld [vmem:[%s3941_s14] sm:$0xff]   ;;  %v3975_v42 = vld [vmem:[%s3941_s14 + $0x8] sm:$0xff]   ;;  %v1197_v9 = vsel %vm415_vm3, %v1192_v13, %v3966_v4  ;;  %v602_v8 = vsel %vm520_vm0, %v599_v38, %v601_v33  ;;  %v1438_v13 = vshll.u32 %v3367_v1, 16  ;;  %v1429_v33 = vshll.u32 %v3369_v11, 16 }
  0x60   : > { %1108 = vrot.lane.b32.xlu1 %v3345_v56, %s3504_s27  ;;  %v3958_v56 = vld [vmem:[%s3691_s25 + $0x20] sm:$0xff]   ;;  %v1906_v31 = vshll.u32 %v3358_v57, 16  ;;  %v1904_v34 = vshrl.u32 %v3358_v57, 16 }
  0x61   : > { %1104 = vrot.lane.b32.xlu0 %v3346_v2, %s3504_s27  ;;  %v3351_v19 = vld [vmem:[%s3941_s14] sm:$0xff]   ;;  %v3361_v2 = vld [vmem:[%s3595_s29 + $0x2c] ss:$0 sps:$4 sm:$0x33]   ;;  %v4875_v55 = vrot.slane %v3958_v56, 1 }
  0x62   : > { %v709_v23 = vshrl.u32 %v3361_v2, 16  ;;  %v1908_v38 = vrot.slane %v1906_v31, 1  ;;  %v3362_v57 = vld [vmem:[%s3941_s14] sm:$0xfe]   ;;  %v1270_v31 = vsel %vm520_vm0, %v1267_v54, %v1269_v10 }
  0x63   : > { %v1274_v32 = vsel %vm520_vm0, %v1271_v48, %v4875_v55  ;;  %v4013_v48 = vld [vmem:[%s3941_s14 + $0x8] sm:$0xff]  }
  0x64   : > { %536 = vrot.lane.b32.xlu1 %v527_v28, %s3497_s6  ;;  %v1342_v28 = vrot.slane %v3972_v26, 1  ;;  %v711_v35 = vrot.slane %v709_v23, 1  ;;  %v3366_v54 = vld [vmem:[%s3595_s29 + $0x2c] ss:$0 sps:$4 sm:$0x33]  }
  0x65   : > { %1787 = vrot.lane.b32.xlu0 %v1778_v7, %s3512_s23  ;;  %v1911_v7 = vshll.u32 %v3975_v42, 16 }
  0x67   : > { %v4004_v36 = vrot.slane %v1911_v7, 1  ;;  %v3368_v7 = vld [vmem:[%s3691_s25 + $0x24] sm:$0xff]  }
  0x68   : > { %1208 = vrot.lane.b32.xlu1 %v1181_v50, %s3505_s28  ;;  %v712_v50 = vshll.u32 %v3361_v2, 16  ;;  %v1426_v2 = vshrl.u32 %v3369_v11, 16  ;;  %v4873_v11 = vrot.slane %v4013_v48, 1 }
  0x69   : > { %540 = vrot.lane.b32.xlu0 %v531_v62, %s3497_s6  ;;  %v3997_v62 = vsel %vm520_vm0, %v1340_v60, %v1342_v28  ;;  %s3517_s6 = smov 80  }
  0x6a   : > { %v714_v40 = vrot.slane %v712_v50, 2  ;;  %v1428_v23 = vrot.slane %v1426_v2, 1  ;;  %v1431_v50 = vrot.slane %v1429_v33, 2  ;;  %v4036_v2 = vld [vmem:[%s3691_s25 + $0x1c] sm:$0xff]  }
  0x6c   : > { %1843 = vrot.lane.b32.xlu1 %v3351_v19, %s3513_s10  ;;  %v1435_v19 = vshrl.u32 %v3367_v1, 16 }
  0x6d   : > { %1212 = vrot.lane.b32.xlu0 %v1197_v9, %s3505_s28  ;;  %v1909_v9 = vor.u32 %v1908_v38, %v1904_v34  ;;  %v715_v34 = vor.u32 %v714_v40, %v711_v35  ;;  %v1341_v35 = vsel %vm520_vm0, %v1338_v61, %v1340_v60  ;;  %v787_v61 = vrot.slane %v3366_v54, 2 }
  0x6e   : > { %v1437_v1 = vrot.slane %v1435_v19, 1  ;;  %v4028_v19 = vor.u32 %v1431_v50, %v1428_v23  ;;  %v3374_v23 = vld [vmem:[%s3941_s14 + $0x4] sm:$0xfe]   ;;  %v3516_v50 = vmov 1065369472  }
  0x6f   : > { %v1914_v10 = vsel %vm415_vm3, %v1909_v9, %v4004_v36  ;;  %v716_v33 = vsel %vm663_vm4, %v3791_v39, %v715_v34  ;;  %v3515_v9 = vmov 0   ;;  %v788_v34 = vsel %vm777_vm1, %v785_v29, %v787_v61 }
  0x70   : > { %611 = vrot.lane.b32.xlu1 %v602_v8, %s3496_s5  ;;  %v1440_v8 = vrot.slane %v1438_v13, 2  ;;  %v2007_v13 = vrot.slane %v3362_v57, 1  ;;  %v4874_v57 = vrot.slane %v4021_v47, 1  ;;  %319 = vst.msk [vmem:[#allocation2] sm:$0xff] %vm318_vm6, %v3515_v9  ;;  %320 = vst.msk [vmem:[#allocation2 + $0x8] sm:$0xff] %vm318_vm6, %v3515_v9 }
  0x71   : > { %607 = vrot.lane.b32.xlu0 %v598_v51, %s3496_s5  ;;  %v698_v51 = vsel %vm663_vm4, %v3767_v59, %v3789_v5  ;;  %v1447_v59 = vshll.u32 %v3368_v7, 16  ;;  %v4033_v5 = vld [vmem:[%s3691_s25 + $0x14] sm:$0xff]   ;;  %s3514_s5 = smov 76   ;;  %321 = vst.msk [vmem:[#allocation2 + $0x10] sm:$0xff] %vm318_vm6, %v3515_v9  ;;  %322 = vst.msk [vmem:[#allocation2 + $0x18] sm:$0xff] %vm318_vm6, %v3515_v9 }
  0x72   : > { %v4026_v38 = vor.u32 %v1440_v8, %v1437_v1  ;;  %v2009_v53 = vsel %vm520_vm0, %v2007_v13, %v4873_v11  ;;  %v1524_v60 = vrot.slane %v4033_v5, 2  ;;  %v3378_v1 = vld [vmem:[%s3595_s29] sm:$0xff]   ;;  %323 = vst.msk [vmem:[#allocation2 + $0x20] sm:$0xff] %vm318_vm6, %v3515_v9  ;;  %v1345_v54 = vsel %vm520_vm0, %v1342_v28, %v4874_v57  ;;  %v4094_v9 = vld [vmem:[%s3691_s25 + $0x18] sm:$0xff]  }
  0x73   : > { %v1449_v8 = vrot.slane %v1447_v59, 2  ;;  %325 = vst.msk [vmem:[#allocation2] sm:$0xff] %vm324_vm7, %v3516_v50  ;;  %326 = vst.msk [vmem:[#allocation2 + $0x8] sm:$0xff] %vm324_vm7, %v3516_v50  ;;  %v4089_v59 = vld [vmem:[%s3941_s14 + $0xc] sm:$0xff]   ;;  %v2150_v28 = vshrl.u32 %v3374_v23, 16  ;;  %v1595_v29 = vrot.slane %v4094_v9, 2 }
  0x74   : > { %1283 = vrot.lane.b32.xlu1 %v1274_v32, %s3506_s30  ;;  %v1444_v32 = vshrl.u32 %v3368_v7, 16  ;;  %v4044_v40 = vsel %vm663_vm4, %v4028_v19, %v4026_v38  ;;  %v3375_v7 = vld [vmem:[%s3941_s14 + $0xc] sm:$0xff]   ;;  %327 = vst.msk [vmem:[#allocation2 + $0x10] sm:$0xff] %vm324_vm7, %v3516_v50  ;;  %328 = vst.msk [vmem:[#allocation2 + $0x18] sm:$0xff] %vm324_vm7, %v3516_v50  ;;  %vm4886_vm6 = vcmask 294144  }
  0x75   : > { %1279 = vrot.lane.b32.xlu0 %v1270_v31, %s3506_s30  ;;  %v1526_v31 = vrot.slane %v4036_v2, 2  ;;  %329 = vst.msk [vmem:[#allocation2 + $0x20] sm:$0xff] %vm324_vm7, %v3516_v50  ;;  %v2158_v26 = vshrl.u32 %v3375_v7, 16  ;;  %v3384_v50 = vld [vmem:[%s3595_s29 + $0x8] sm:$0xff]   ;;  %v2152_v11 = vrot.slane %v2150_v28, 1  ;;  %v1182_v2 = vshrl.u32 %v3902_v15, 16 }
  0x76   : > { %v1446_v39 = vrot.slane %v1444_v32, 1  ;;  %371 = vst.msk [vmem:[#allocation2] sm:$0xff] %vm370_vm8, %v3378_v1  ;;  %v3370_v32 = vld [vmem:[%s3941_s14 + $0x4] sm:$0xfe]   ;;  %v2153_v1 = vshll.u32 %v3374_v23, 16  ;;  %372 = vst.msk [vmem:[#allocation2 + $0x8] sm:$0xff] %vm370_vm8, %v3384_v50 }
  0x77   : > { %v2078_v23 = vrot.slane %v3370_v32, 1  ;;  %v3387_v50 = vld [vmem:[%s3691_s25 + $0x18] sm:$0xff]   ;;  %v1184_v15 = vor.u32 %v1182_v2, %v3927_v63  ;;  %vm1117_vm7 = vcmask 326944  }
  0x78   : > { %721 = vrot.lane.b32.xlu1 %v698_v51, %s3502_s13  ;;  %v4070_v51 = vsel %vm777_vm1, %v1524_v60, %v1526_v31  ;;  %v4085_v13 = vor.u32 %v1449_v8, %v1446_v39  ;;  %v3373_v39 = vld [vmem:[%s3595_s29 + $0x30] ss:$0 sps:$4 sm:$0x33]   ;;  %v2155_v57 = vrot.slane %v2153_v1, 2  ;;  %v1681_v16 = vshrl.u32 %v3387_v50, 16 }
  0x79   : > { %1947 = vrot.lane.b32.xlu0 %v1914_v10, %s3514_s5  ;;  %v4080_v10 = vld [vmem:[%s3691_s25 + $0x20] sm:$0xff]   ;;  %v858_v55 = vrot.slane %v3373_v39, 2  ;;  %v4203_v63 = vsel %vm415_vm3, %v1184_v15, %v3946_v20 }
  0x7a   : > { %v1597_v24 = vrot.slane %v4080_v10, 2  ;;  %v1451_v61 = vsel %vm663_vm4, %v4026_v38, %v4085_v13  ;;  %v2079_v38 = vrot.slane %v4089_v59, 1  ;;  %v1683_v39 = vrot.slane %v1681_v16, 2  ;;  %v4175_v16 = vld [vmem:[%s3941_s14 + $0xc] sm:$0xff]  }
  0x7b   : > { %v859_v5 = vsel %vm777_vm1, %v856_v49, %v858_v55  ;;  %v4160_v49 = vld [vmem:[%s3691_s25 + $0x20] sm:$0xff]   ;;  %v1529_v55 = vsel %vm777_vm1, %v1526_v31, %v1528_v46  ;;  %v1596_v10 = vsel %vm777_vm1, %v1593_v30, %v1595_v29 }
  0x7c   : > { %1350 = vrot.lane.b32.xlu1 %v1341_v35, %s3507_s8  ;;  %v2161_v35 = vshll.u32 %v3375_v7, 16  ;;  %v4114_v8 = vsel %vm777_vm1, %v1595_v29, %v1597_v24  ;;  %v1433_v7 = vsel %vm663_vm4, %v3823_v3, %v4028_v19  ;;  %v2080_v41 = vsel %vm520_vm0, %v2078_v23, %v2079_v38 }
  0x7d   : > { %725 = vrot.lane.b32.xlu0 %v716_v33, %s3502_s13  ;;  %v3379_v33 = vld [vmem:[%s3595_s29 + $0x30] ss:$0 sps:$4 sm:$0x77]   ;;  %s4891_s13 = smov 56  }
  0x7e   : > { %v2163_v3 = vrot.slane %v2161_v35, 2  ;;  %v969_v19 = vshll.u32 %v3379_v33, 16  ;;  %v2156_v35 = vor.u32 %v2155_v57, %v2152_v11  ;;  %v4154_v57 = vld [vmem:[%s3691_s25 + $0x28] sm:$0xff]  }
  0x80   : > { %2018 = vrot.lane.b32.xlu1 %v2009_v53, %s3517_s6  ;;  %v3383_v53 = vld [vmem:[%s3595_s29 + $0x18] sm:$0xff]   ;;  %v971_v1 = vrot.slane %v969_v19, 3 }
  0x81   : > { %1354 = vrot.lane.b32.xlu0 %v1345_v54, %s3507_s8  ;;  %374 = vst.msk [vmem:[#allocation2 + $0x18] sm:$0xff] %vm370_vm8, %v3383_v53  ;;  %v966_v53 = vshrl.u32 %v3379_v33, 16  ;;  %v4170_v19 = vld [vmem:[%s3691_s25 + $0x18] sm:$0xff]  }
  0x84   : > { %797 = vrot.lane.b32.xlu1 %v788_v34, %s3499_s9  ;;  %v2160_v34 = vrot.slane %v2158_v26, 1  ;;  %v1525_v26 = vsel %vm777_vm1, %v1522_v14, %v1524_v60 }
  0x85   : > { %793 = vrot.lane.b32.xlu0 %v3808_v52, %s3499_s9  ;;  %v855_v52 = vsel %vm777_vm1, %v852_v45, %v854_v17  ;;  %v1684_v45 = vshll.u32 %v3387_v50, 16  ;;  %v968_v17 = vrot.slane %v966_v53, 2  ;;  %s3518_s9 = smov 84  }
  0x86   : > { %v4144_v33 = vor.u32 %v2163_v3, %v2160_v34 }
  0x87   : > { %v1686_v14 = vrot.slane %v1684_v45, 3  ;;  %v1781_v45 = vrot.slane %v4160_v49, 3 }
  0x88   : > { %1467 = vrot.lane.b32.xlu1 %v1451_v61, %s3508_s12  ;;  %v3391_v61 = vld [vmem:[%s3691_s25 + $0x20] sm:$0xff]   ;;  %v2165_v23 = vsel %vm663_vm4, %v2156_v35, %v4144_v33 }
  0x89   : > { %1463 = vrot.lane.b32.xlu0 %v1433_v7, %s3508_s12  ;;  %v1690_v60 = vshrl.u32 %v3391_v61, 16  ;;  %v1693_v7 = vshll.u32 %v3391_v61, 16  ;;  %v1687_v50 = vor.u32 %v1686_v14, %v1683_v39  ;;  %v3392_v61 = vld [vmem:[%s3691_s25 + $0x28] sm:$0xff]   ;;  %v3388_v14 = vld [vmem:[%s3595_s29 + $0x30] ss:$0 sps:$4 sm:$0x77]  }
  0x8a   : > { %v1699_v20 = vshrl.u32 %v3392_v61, 16  ;;  %v1044_v18 = vrot.slane %v3388_v14, 3  ;;  %v3394_v14 = vld [vmem:[%s3691_s25 + $0x10] sm:$0xff]  }
  0x8b   : > { %v1692_v25 = vrot.slane %v1690_v60, 2  ;;  %v1695_v34 = vrot.slane %v1693_v7, 3 }
  0x8c   : > { %864 = vrot.lane.b32.xlu1 %v855_v52, %s3498_s7  ;;  %v972_v52 = vor.u32 %v971_v1, %v968_v17  ;;  %v1779_v17 = vrot.slane %v4170_v19, 3  ;;  %v3385_v1 = vld [vmem:[%s3941_s14 + $0x4] sm:$0xfc]   ;;  %v1701_v30 = vrot.slane %v1699_v20, 2  ;;  %v3414_v20 = vld [vmem:[%s3595_s29 + $0x10] sm:$0xff]  }
  0x8d   : > { %2089 = vrot.lane.b32.xlu0 %v2080_v41, %s3518_s9  ;;  %v4167_v3 = vor.u32 %v1695_v34, %v1692_v25  ;;  %v1599_v41 = vrot.slane %v4154_v57, 2  ;;  %373 = vst.msk [vmem:[#allocation2 + $0x10] sm:$0xff] %vm370_vm8, %v3414_v20 }
  0x8e   : > { %v4120_v54 = vpop.permute.xlu1 %603  ;;  %v973_v31 = vsel %vm920_vm5, %v3856_v22, %v972_v52  ;;  %v1198_v22 = vshrl.u32 %v3924_v44, 16  ;;  %v1688_v52 = vsel %vm920_vm5, %v3890_v6, %v1687_v50 }
  0x8f   : > { %v533_v32 = vpop.permute.xlu0 %532  ;;  %v1600_v44 = vsel %vm777_vm1, %v1597_v24, %v1599_v41  ;;  %v2262_v24 = vrot.slane %v3385_v1, 2 }
  0x90   : > { %1534 = vrot.lane.b32.xlu1 %v1525_v26, %s4891_s13  ;;  %v4184_v26 = vsel %vm920_vm5, %v1687_v50, %v4167_v3  ;;  %v4215_v60 = vor.u32 %v1198_v22, %v3966_v4  ;;  %v3389_v4 = vld [vmem:[%s3941_s14 + $0x8] sm:$0xfc]  }
  0x91   : > { %868 = vrot.lane.b32.xlu0 %v859_v5, %s3498_s7  ;;  %v4197_v5 = vsel %vm1034_vm2, %v1779_v17, %v1781_v45  ;;  %s4892_s7 = smov 28   ;;  %v2333_v25 = vrot.slane %v3389_v4, 2  ;;  %v3398_v50 = vld [vmem:[%s3941_s14 + $0x8] sm:$0xfc]  }
  0x92   : > { %v4142_v28 = vpop.permute.xlu1 %860  ;;  %v2405_v22 = vshrl.u32 %v3398_v50, 16 }
  0x93   : > { %v790_v11 = vpop.permute.xlu0 %789 }
  0x94   : > { %2202 = vrot.lane.b32.xlu1 %v2165_v23, %s3519_s26 }
  0x95   : > { %1538 = vrot.lane.b32.xlu0 %v1529_v55, %s4891_s13  ;;  %v3399_v55 = vld [vmem:[%s3941_s14 + $0x10] sm:$0xff]  }
  0x96   : > { %v1047_v53 = vpop.permute.xlu1 %1046  ;;  %v2416_v1 = vshll.u32 %v3399_v55, 16 }
  0x97   : > { %v461_v35 = vpop.permute.xlu0 %460 }
  0x98   : > { %476 = vst.msk [vmem:[#allocation2] sm:$0xff] %vm4877_vm9, %v461_v35  ;;  %982 = vrot.lane.b32.xlu1 %v973_v31, %s4892_s7  ;;  %v2418_v4 = vrot.slane %v2416_v1, 3 }
  0x99   : > { %548 = vst.msk [vmem:[#allocation2] sm:$0xff] %vm547_vm10, %v533_v32  ;;  %v2263_v32 = vrot.slane %v4175_v16, 2  ;;  %978 = vrot.lane.b32.xlu0 %v3879_v21, %s4892_s7  ;;  %s4895_s7 = smov 64  }
  0x9a   : > { %v718_v39 = vpop.permute.xlu1 %717  ;;  %619 = vst.msk [vmem:[#allocation2] sm:$0xff] %vm618_vm11, %v4120_v54  ;;  %v1702_v54 = vshll.u32 %v3392_v61, 16  ;;  %v3413_v61 = vld [vmem:[%s3595_s29 + $0x20] sm:$0xff]   ;;  %s3522_s29 = smov 100  }
  0x9b   : > { %733 = vst.msk [vmem:[#allocation2] sm:$0xff] %vm4882_vm12, %v718_v39  ;;  %v975_v7 = vpop.permute.xlu0 %974  ;;  %v2264_v29 = vsel %vm777_vm1, %v2262_v24, %v2263_v32  ;;  %v2408_v39 = vshll.u32 %v3398_v50, 16 }
  0x9c   : > { %805 = vst.msk [vmem:[#allocation2] sm:$0xff] %vm804_vm13, %v790_v11  ;;  %1609 = vrot.lane.b32.xlu1 %v1600_v44, %s4893_s24  ;;  %v4232_v11 = vld [vmem:[%s3941_s14 + $0x10] sm:$0xff]   ;;  %v1704_v9 = vrot.slane %v1702_v54, 3 }
  0x9d   : > { %876 = vst.msk [vmem:[#allocation2] sm:$0xff] %vm875_vm14, %v4142_v28  ;;  %1605 = vrot.lane.b32.xlu0 %v1596_v10, %s4893_s24  ;;  %v2334_v34 = vrot.slane %v4232_v11, 2  ;;  %v3401_v10 = vld [vmem:[%s3691_s25 + $0x28] ss:$0 sps:$4 sm:$0x11]  }
  0x9e   : > { %990 = vst.msk [vmem:[#allocation2] sm:$0xff] %vm4884_vm15, %v975_v7  ;;  %v467_v21 = vpop.permute.xlu1 %466  ;;  %v4253_v6 = vor.u32 %v1704_v9, %v1701_v30  ;;  %v2410_v7 = vrot.slane %v2408_v39, 3  ;;  %v1202_v49 = vshll.u32 %v3401_v10, 16  ;;  %v3404_v10 = vld [vmem:[%s3941_s14 + $0x18] sm:$0xff]  }
  0x9f   : > { %479 = vst.msk [vmem:[#allocation2 + $0x18] sm:$0xff] %vm4877_vm9, %v467_v21  ;;  %v463_v28 = vpop.permute.xlu0 %462  ;;  %v2335_v0 = vsel %vm777_vm1, %v2333_v25, %v2334_v34  ;;  %v4301_v25 = vld [vmem:[%s3941_s14 + $0x10] sm:$0xff]  }
  0xa0   : > { %1062 = vst.msk [vmem:[#allocation2] sm:$0xff] %vm4886_vm6, %v1047_v53  ;;  %1050 = vrot.lane.b32.xlu1 %v3887_v12, %s4894_s11  ;;  %v1915_v53 = vshrl.u32 %v3975_v42, 16  ;;  %v1045_v12 = vsel %vm1034_vm2, %v1042_v43, %v1044_v18  ;;  %v4265_v42 = vld [vmem:[%s3691_s25 + $0x28] sm:$0xff]   ;;  %v2413_v43 = vshrl.u32 %v3399_v55, 16  ;;  %v1706_v15 = vsel %vm920_vm5, %v4167_v3, %v4253_v6 }
  0xa1   : > { %477 = vst.msk [vmem:[#allocation2 + $0x8] sm:$0xff] %vm4877_vm9, %v463_v28  ;;  %2273 = vrot.lane.b32.xlu0 %v2264_v29, %s4878_s22  ;;  %vm4880_vm9 = vcmask 359744   ;;  %s3521_s22 = smov 96   ;;  %v1783_v54 = vrot.slane %v4265_v42, 3  ;;  %v2407_v3 = vrot.slane %v2405_v22, 2  ;;  %v4896_v29 = vrot.slane %v3910_v58, 3 }
  0xa2   : > { %v535_v23 = vpop.permute.xlu1 %534  ;;  %v4257_v2 = vor.u32 %v1915_v53, %v4004_v36  ;;  %v3393_v36 = vld [vmem:[%s3691_s25 + $0x20] sm:$0xff]   ;;  %375 = vst.msk [vmem:[#allocation2 + $0x20] sm:$0xff] %vm370_vm8, %v3413_v61  ;;  %v2415_v21 = vrot.slane %v2413_v43, 2  ;;  %vm1292_vm8 = vcmask 392544   ;;  %v3402_v55 = vld [vmem:[%s3941_s14 + $0x8] sm:$0xf8]  }
  0xa3   : > { %549 = vst.msk [vmem:[#allocation2 + $0x8] sm:$0xff] %vm547_vm10, %v535_v23  ;;  %v1103_v31 = vpop.permute.xlu0 %1102  ;;  %v1784_v30 = vsel %vm1034_vm2, %v1781_v45, %v1783_v54  ;;  %v1780_v28 = vsel %vm1034_vm2, %v4896_v29, %v1779_v17  ;;  %v2411_v23 = vor.u32 %v2410_v7, %v2407_v3  ;;  %v3406_v53 = vld [vmem:[%s3941_s14 + $0x18] sm:$0xff]   ;;  %v3400_v17 = vld [vmem:[%s3941_s14 + $0x8] sm:$0xff]   ;;  %v2518_v50 = vrot.slane %v4301_v25, 3  ;;  %v4316_v43 = vld [vmem:[%s3941_s14 + $0x20] sm:$0xff]  }
  0xa4   : > { %1718 = vrot.lane.b32.xlu1 %v1688_v52, %s4895_s7  ;;  %1118 = vst.msk [vmem:[#allocation2] sm:$0xff] %vm1117_vm7, %v1103_v31  ;;  %v4298_v52 = vor.u32 %v2418_v4, %v2415_v21  ;;  %v1935_v22 = vshll.u32 %v4316_v43, 16  ;;  %v3409_v3 = vld [vmem:[%s3691_s25 + $0x2c] ss:$0 sps:$4 sm:$0x11]  }
  0xa5   : > { %1054 = vrot.lane.b32.xlu0 %v1045_v12, %s4894_s11  ;;  %v1204_v12 = vrot.slane %v1202_v49, 1  ;;  %v3415_v4 = vld [vmem:[%s3691_s25 + $0x2c] ss:$0 sps:$4 sm:$0x33]   ;;  %v4355_v49 = vld [vmem:[%s3941_s14 + $0x18] sm:$0xff]   ;;  %s4904_s11 = smov 92  }
  0xa6   : > { %v1207_v35 = vpop.permute.xlu1 %1206  ;;  %v2420_v19 = vsel %vm920_vm5, %v2411_v23, %v4298_v52  ;;  %v4341_v21 = vrot.slane %v1935_v22, 1 }
  0xa7   : > { %1222 = vst.msk [vmem:[#allocation2] sm:$0xff] %vm4880_vm9, %v1207_v35  ;;  %v539_v44 = vpop.permute.xlu0 %538  ;;  %vm4881_vm9 = vcmask 425344   ;;  %v3405_v35 = vld [vmem:[%s3691_s25 + $0x28] ss:$0 sps:$4 sm:$0x11]   ;;  %v1205_v61 = vsel %vm415_vm3, %v4215_v60, %v1204_v12  ;;  %v1931_v60 = vshrl.u32 %v3406_v53, 16 }
  0xa8   : > { %2344 = vrot.lane.b32.xlu1 %v2335_v0, %s3521_s22  ;;  %551 = vst.msk [vmem:[#allocation2 + $0x18] sm:$0xff] %vm547_vm10, %v539_v44  ;;  %v2517_v0 = vrot.slane %v3402_v55, 3  ;;  %v1275_v44 = vrot.slane %v3405_v35, 1  ;;  %v1346_v55 = vrot.slane %v3409_v3, 1  ;;  %v4370_v12 = vld [vmem:[%s3941_s14 + $0x10] sm:$0xff]  }
  0xa9   : > { %1722 = vrot.lane.b32.xlu0 %v1706_v15, %s4895_s7  ;;  %v4325_v15 = vld [vmem:[%s3941_s14 + $0x10] sm:$0xff]   ;;  %v2010_v22 = vrot.slane %v4370_v12, 1 }
  0xaa   : > { %v610_v24 = vpop.permute.xlu1 %609  ;;  %v2519_v39 = vsel %vm1034_vm2, %v2517_v0, %v2518_v50  ;;  %v2012_v0 = vrot.slane %v4355_v49, 1 }
  0xab   : > { %622 = vst.msk [vmem:[#allocation2 + $0x18] sm:$0xff] %vm618_vm11, %v610_v24  ;;  %v606_v18 = vpop.permute.xlu0 %605  ;;  %v1919_v24 = vshll.u32 %v4325_v15, 16 }
  0xac   : > { %1110 = vrot.lane.b32.xlu1 %v3393_v36, %s3504_s27  ;;  %620 = vst.msk [vmem:[#allocation2 + $0x8] sm:$0xff] %vm618_vm11, %v606_v18  ;;  %v1927_v36 = vshll.u32 %v3406_v53, 16  ;;  %v4897_v18 = vrot.slane %v3958_v56, 1  ;;  %v1453_v53 = vshrl.u32 %v3415_v4, 16 }
  0xad   : > { %1106 = vrot.lane.b32.xlu0 %v3394_v14, %s3504_s27  ;;  %s3523_s27 = smov 104  }
  0xae   : > { %v720_v9 = vpop.permute.xlu1 %719  ;;  %v4333_v14 = vrot.slane %v1927_v36, 1 }
  0xaf   : > { %734 = vst.msk [vmem:[#allocation2 + $0x8] sm:$0xff] %vm4882_vm12, %v720_v9  ;;  %v1278_v45 = vpop.permute.xlu0 %1277 }
  0xb0   : > { %1793 = vrot.lane.b32.xlu1 %v1784_v30, %s3512_s23  ;;  %1293 = vst.msk [vmem:[#allocation2] sm:$0xff] %vm1292_vm8, %v1278_v45  ;;  %v1276_v30 = vsel %vm520_vm0, %v4897_v18, %v1275_v44  ;;  %v1933_v9 = vor.u32 %v1931_v60, %v4333_v14  ;;  %v4358_v45 = vld [vmem:[%s3941_s14 + $0x20] sm:$0xff]  }
  0xb1   : > { %1789 = vrot.lane.b32.xlu0 %v1780_v28, %s3512_s23  ;;  %v4351_v28 = vrot.slane %v1919_v24, 1  ;;  %v2014_v35 = vrot.slane %v4358_v45, 1  ;;  %v3420_v44 = vld [vmem:[%s3941_s14 + $0x1c] sm:$0xff]  }
  0xb2   : > { %v1349_v58 = vpop.permute.xlu1 %1348  ;;  %v1938_v56 = vsel %vm415_vm3, %v1933_v9, %v4341_v21  ;;  %v3446_v24 = vld [vmem:[%s4861_s3] sm:$0xff]   ;;  %v3419_v9 = vld [vmem:[%s3691_s25 + $0x2c] ss:$0 sps:$4 sm:$0x33]  }
  0xb3   : > { %1364 = vst.msk [vmem:[#allocation2] sm:$0xff] %vm4881_vm9, %v1349_v58  ;;  %v724_v31 = vpop.permute.xlu0 %723  ;;  %vm1476_vm9 = vcmask 458144   ;;  %v1456_v58 = vshll.u32 %v3415_v4, 16  ;;  %v2015_v60 = vsel %vm520_vm0, %v2012_v0, %v2014_v35  ;;  %v4899_v4 = vrot.slane %v4013_v48, 1 }
  0xb4   : > { %1210 = vrot.lane.b32.xlu1 %v4203_v63, %s3505_s28  ;;  %736 = vst.msk [vmem:[#allocation2 + $0x18] sm:$0xff] %vm4882_vm12, %v724_v31  ;;  %vm4883_vm12 = vcmask 490944  }
  0xb5   : > { %2457 = vrot.lane.b32.xlu0 %v2420_v19, %s3522_s29  ;;  %v2011_v18 = vsel %vm520_vm0, %v4899_v4, %v2010_v22 }
  0xb6   : > { %v796_v1 = vpop.permute.xlu1 %795 }
  0xb7   : > { %808 = vst.msk [vmem:[#allocation2 + $0x18] sm:$0xff] %vm804_vm13, %v796_v1  ;;  %v792_v63 = vpop.permute.xlu0 %791  ;;  %v1455_v1 = vrot.slane %v1453_v53, 1 }
  0xb8   : > { %1845 = vrot.lane.b32.xlu1 %v3400_v17, %s3513_s10  ;;  %806 = vst.msk [vmem:[#allocation2 + $0x8] sm:$0xff] %vm804_vm13, %v792_v63  ;;  %v1922_v17 = vsel %vm415_vm3, %v4257_v2, %v4351_v28  ;;  %v1458_v2 = vrot.slane %v1456_v58, 2  ;;  %v4381_v63 = vld [vmem:[%s3941_s14 + $0x1c] sm:$0xff]  }
  0xb9   : > { %1214 = vrot.lane.b32.xlu0 %v1205_v61, %s3505_s28 }
  0xba   : > { %v863_v20 = vpop.permute.xlu1 %862 }
  0xbb   : > { %877 = vst.msk [vmem:[#allocation2 + $0x8] sm:$0xff] %vm875_vm14, %v863_v20  ;;  %v1462_v7 = vpop.permute.xlu0 %1461  ;;  %v1459_v20 = vor.u32 %v1458_v2, %v1455_v1  ;;  %v1530_v2 = vrot.slane %v3419_v9, 2  ;;  %v3423_v9 = vld [vmem:[%s3691_s25 + $0x30] ss:$0 sps:$4 sm:$0x33]  }
  0xbc   : > { %2528 = vrot.lane.b32.xlu1 %v2519_v39, %s3523_s27  ;;  %1477 = vst.msk [vmem:[#allocation2] sm:$0xff] %vm1476_vm9, %v1462_v7  ;;  %v2083_v7 = vrot.slane %v4381_v63, 1 }
  0xbd   : > { %1849 = vrot.lane.b32.xlu0 %v3404_v10, %s3513_s10  ;;  %v3421_v10 = vld [vmem:[%s3941_s14 + $0x24] sm:$0xff]   ;;  %v1460_v53 = vsel %vm663_vm4, %v4085_v13, %v1459_v20  ;;  %v1531_v59 = vsel %vm777_vm1, %v1528_v46, %v1530_v2 }
  0xbe   : > { %v1533_v29 = vpop.permute.xlu1 %1532  ;;  %v2185_v58 = vshrl.u32 %v3421_v10, 16 }
  0xbf   : > { %1548 = vst.msk [vmem:[#allocation2] sm:$0xff] %vm4883_vm12, %v1533_v29  ;;  %v867_v23 = vpop.permute.xlu0 %866  ;;  %vm1618_vm12 = vcmask 523744   ;;  %v3422_v29 = vld [vmem:[%s3941_s14 + $0x14] sm:$0xff]  }
  0xc0   : > { %1285 = vrot.lane.b32.xlu1 %v1276_v30, %s3506_s30  ;;  %879 = vst.msk [vmem:[#allocation2 + $0x18] sm:$0xff] %vm875_vm14, %v867_v23  ;;  %v4410_v30 = vld [vmem:[%s3941_s14 + $0x14] sm:$0xff]  }
  0xc1   : > { %1281 = vrot.lane.b32.xlu0 %v3951_v37, %s3506_s30  ;;  %v4898_v37 = vrot.slane %v4021_v47, 1  ;;  %v4387_v47 = vld [vmem:[%s3941_s14 + $0x24] sm:$0xff]   ;;  %v2081_v13 = vrot.slane %v4410_v30, 1 }
  0xc2   : > { %v981_v19 = vpop.permute.xlu1 %980  ;;  %v2085_v48 = vrot.slane %v4387_v47, 1 }
  0xc3   : > { %993 = vst.msk [vmem:[#allocation2 + $0x18] sm:$0xff] %vm4884_vm15, %v981_v19  ;;  %v977_v31 = vpop.permute.xlu0 %976  ;;  %v1347_v36 = vsel %vm520_vm0, %v4898_v37, %v1346_v55  ;;  %v3524_v55 = vmov 0.0   ;;  %v2188_v19 = vshll.u32 %v3421_v10, 16  ;;  %v2167_v37 = vshrl.u32 %v3422_v29, 16  ;;  %v3450_v10 = vld [vmem:[%s4861_s3 + $0x10] sm:$0xff]  }
  0xc4   : > { %1953 = vrot.lane.b32.xlu1 %v1938_v56, %s3514_s5  ;;  %991 = vst.msk [vmem:[#allocation2 + $0x8] sm:$0xff] %vm4884_vm15, %v977_v31  ;;  %vm4885_vm15 = vcmask 556544   ;;  %v2176_v56 = vshrl.u32 %v3420_v44, 16  ;;  %3160 = vmatprep.subr.bf16.mxu0 %v3524_v55  ;;  %v2084_v12 = vsel %vm520_vm0, %v2081_v13, %v2083_v7 }
  0xc5   : > { %1949 = vrot.lane.b32.xlu0 %v1922_v17, %s3514_s5  ;;  %3161 = vmatpush3.bf16.msra.mxu0 %v3446_v24  ;;  %v3448_v17 = vld [vmem:[%s4861_s3 + $0x8] sm:$0xff]   ;;  %v2190_v20 = vrot.slane %v2188_v19, 2  ;;  %v2169_v4 = vrot.slane %v2167_v37, 1  ;;  %v1601_v19 = vrot.slane %v3423_v9, 2 }
  0xc6   : > { %v1049_v61 = vpop.permute.xlu1 %1048  ;;  %3196 = vmatprep.subr.bf16.mxu1 %v3524_v55  ;;  %3162 = vmatprep.subr.bf16.mxu0 %v3524_v55 }
  0xc7   : > { %1063 = vst.msk [vmem:[#allocation2 + $0x8] sm:$0xff] %vm4886_vm6, %v1049_v61  ;;  %v1604_v39 = vpop.permute.xlu0 %1603  ;;  %3204 = vmatpush3.bf16.msra.mxu1 %v3446_v24  ;;  %v2178_v61 = vrot.slane %v2176_v56, 1  ;;  %v3451_v56 = vld [vmem:[%s4861_s3 + $0x18] sm:$0xff]  }
  0xc8   : > { %1356 = vrot.lane.b32.xlu1 %v1347_v36, %s3507_s8  ;;  %1619 = vst.msk [vmem:[#allocation2] sm:$0xff] %vm1618_vm12, %v1604_v39  ;;  %v2170_v36 = vshll.u32 %v3422_v29, 16  ;;  %3197 = vmatprep.subr.bf16.mxu1 %v3524_v55 }
  0xc9   : > { %1352 = vrot.lane.b32.xlu0 %v3997_v62, %s3507_s8  ;;  %v2179_v62 = vshll.u32 %v3420_v44, 16  ;;  %v2086_v44 = vsel %vm520_vm0, %v2083_v7, %v2085_v48  ;;  %3163 = vmatpush3.bf16.msra.mxu0 %v3448_v17 }
  0xca   : > { %v1717_v3 = vpop.permute.xlu1 %1716  ;;  %3164 = vmatprep.subr.bf16.mxu0 %v3524_v55 }
  0xcb   : > { %1732 = vst.msk [vmem:[#allocation2] sm:$0xff] %vm4885_vm15, %v1717_v3  ;;  %v1053_v23 = vpop.permute.xlu0 %1052  ;;  %vm4900_vm15 = vcmask 64544   ;;  %v2181_v39 = vrot.slane %v2179_v62, 2  ;;  %v2082_v3 = vsel %vm520_vm0, %v2079_v38, %v2081_v13  ;;  %3205 = vmatpush3.bf16.msra.mxu1 %v3448_v17  ;;  %v4482_v17 = vld [vmem:[%s3941_s14 + $0x24] sm:$0xff]  }
  0xcc   : > { %2024 = vrot.lane.b32.xlu1 %v2015_v60, %s3517_s6  ;;  %1065 = vst.msk [vmem:[#allocation2 + $0x18] sm:$0xff] %vm4886_vm6, %v1053_v23  ;;  %vm4901_vm6 = vmmov %vm4900_vm15  ;;  %v2187_v60 = vrot.slane %v2185_v58, 1  ;;  %3198 = vmatprep.subr.bf16.mxu1 %v3524_v55  ;;  %v3427_v23 = vld [vmem:[%s3691_s25 + $0x30] ss:$0 sps:$4 sm:$0x77]  }
  0xcd   : > { %2020 = vrot.lane.b32.xlu0 %v2011_v18, %s3517_s6  ;;  %v2172_v18 = vrot.slane %v2170_v36, 2  ;;  %v4457_v38 = vor.u32 %v2181_v39, %v2178_v61  ;;  %3165 = vmatpush3.bf16.msra.mxu0 %v3450_v10  ;;  %v1711_v37 = vshll.u32 %v3427_v23, 16  ;;  %v3452_v36 = vld [vmem:[%s4861_s3 + $0x20] sm:$0xff]   ;;  %v4495_v61 = vld [vmem:[%s3941_s14 + $0x14] sm:$0xff]  }
  0xce   : > { %v469_v31 = vpop.permute.xlu1 %468  ;;  %v4459_v29 = vor.u32 %v2190_v20, %v2187_v60  ;;  %3166 = vmatprep.subr.bf16.mxu0 %v3524_v55  ;;  %v2265_v57 = vrot.slane %v4495_v61, 2 }
  0xcf   : > { %480 = vst.msk [vmem:[#allocation2 + $0x20] sm:$0xff] %vm4900_vm15, %v469_v31  ;;  %v465_v1 = vpop.permute.xlu0 %464  ;;  %vm4887_vm15 = vmmov 0   ;;  %v4470_v46 = vor.u32 %v2172_v18, %v2169_v4  ;;  %3206 = vmatpush3.bf16.msra.mxu1 %v3450_v10  ;;  %v1708_v31 = vshrl.u32 %v3427_v23, 16  ;;  %v1713_v20 = vrot.slane %v1711_v37, 3  ;;  %v3453_v10 = vld [vmem:[%s4861_s3 + $0x28] sm:$0xff]   ;;  %v3432_v18 = vld [vmem:[%s3941_s14 + $0x20] sm:$0xff]  }
  0xd0   : > { %1469 = vrot.lane.b32.xlu1 %v1460_v53, %s3508_s12  ;;  %478 = vst.msk [vmem:[#allocation2 + $0x10] sm:$0xff] %vm4901_vm6, %v465_v1  ;;  %3176 = vmatprep.mubr.msk.bf16.mxu0 %vm4887_vm15, %v3524_v55  ;;  %vm4889_vm6 = vcmask 589344   ;;  %v4474_v53 = vld [vmem:[%s3941_s14 + $0x1c] sm:$0xff]   ;;  %v2192_v58 = vsel %vm663_vm4, %v4457_v38, %v4459_v29  ;;  %v4517_v4 = vld [vmem:[%s3941_s14 + $0x28] sm:$0xff]   ;;  %v3454_v23 = vld [vmem:[%s4861_s3 + $0x30] sm:$0xff]  }
  0xd1   : > { %1465 = vrot.lane.b32.xlu0 %v4044_v40, %s3508_s12  ;;  %3188 = vmatprep.mubr.msk.bf16.mxu1 %vm4887_vm15, %v3524_v55  ;;  %vm4902_vm15 = vcmask 359744   ;;  %v2174_v2 = vsel %vm663_vm4, %v4144_v33, %v4470_v46  ;;  %v2269_v33 = vrot.slane %v4482_v17, 2  ;;  %v1710_v60 = vrot.slane %v1708_v31, 2  ;;  %v3431_v37 = vld [vmem:[%s3691_s25 + $0x30] ss:$0 sps:$4 sm:$0x77]  }
  0xd2   : > { %v1109_v24 = vpop.permute.xlu1 %1108  ;;  %3199 = vmatprep.subr.bf16.mxu1 %v3524_v55  ;;  %3167 = vmatpush3.bf16.msra.mxu0 %v3451_v56  ;;  %v2340_v31 = vrot.slane %v4517_v4, 2  ;;  %v2183_v63 = vsel %vm663_vm4, %v4470_v46, %v4457_v38  ;;  %s3526_s25 = smov 124  }
  0xd3   : > { %1121 = vst.msk [vmem:[#allocation2 + $0x18] sm:$0xff] %vm1117_vm7, %v1109_v24  ;;  %v1105_v40 = vpop.permute.xlu0 %1104  ;;  %3168 = vmatprep.subr.bf16.mxu0 %v3524_v55  ;;  %3207 = vmatpush3.bf16.msra.mxu1 %v3451_v56  ;;  %v1714_v9 = vor.u32 %v1713_v20, %v1710_v60 }
  0xd4   : > { %2095 = vrot.lane.b32.xlu1 %v2086_v44, %s3518_s9  ;;  %1119 = vst.msk [vmem:[#allocation2 + $0x8] sm:$0xff] %vm1117_vm7, %v1105_v40  ;;  %v2267_v44 = vrot.slane %v4474_v53, 2  ;;  %3200 = vmatprep.subr.bf16.mxu1 %v3524_v55 }
  0xd5   : > { %2091 = vrot.lane.b32.xlu0 %v2082_v3, %s3518_s9  ;;  %v4514_v3 = vld [vmem:[%s3941_s14 + $0x20] sm:$0xff]   ;;  %v1715_v16 = vsel %vm920_vm5, %v4253_v6, %v1714_v9 }
  0xd6   : > { %v537_v27 = vpop.permute.xlu1 %536  ;;  %3169 = vmatpush3.bf16.msra.mxu0 %v3452_v36  ;;  %v2270_v40 = vsel %vm777_vm1, %v2267_v44, %v2269_v33  ;;  %v2268_v38 = vsel %vm777_vm1, %v2265_v57, %v2267_v44 }
  0xd7   : > { %550 = vst.msk [vmem:[#allocation2 + $0x10] sm:$0xff] %vm547_vm10, %v537_v27  ;;  %v1788_v62 = vpop.permute.xlu0 %1787  ;;  %3170 = vmatprep.subr.bf16.mxu0 %v3524_v55  ;;  %3208 = vmatpush3.bf16.msra.mxu1 %v3452_v36  ;;  %v2266_v27 = vsel %vm777_vm1, %v2263_v32, %v2265_v57  ;;  %v2431_v36 = vshrl.u32 %v3432_v18, 16  ;;  %v2434_v32 = vshll.u32 %v3432_v18, 16 }
  0xd8   : > { %1540 = vrot.lane.b32.xlu1 %v1531_v59, %s4891_s13  ;;  %1803 = vst.msk [vmem:[#allocation2] sm:$0xff] %vm4889_vm6, %v1788_v62  ;;  %vm1858_vm6 = vcmask 622144   ;;  %3201 = vmatprep.subr.bf16.mxu1 %v3524_v55  ;;  %v3433_v59 = vld [vmem:[%s3941_s14 + $0x28] sm:$0xff]   ;;  %v4541_v62 = vld [vmem:[%s3941_s14 + $0x18] sm:$0xff]  }
  0xd9   : > { %1536 = vrot.lane.b32.xlu0 %v4070_v51, %s4891_s13  ;;  %v1602_v51 = vsel %vm777_vm1, %v1599_v41, %v1601_v19  ;;  %v2336_v60 = vrot.slane %v4541_v62, 2  ;;  %v2433_v18 = vrot.slane %v2431_v36, 2 }
  0xda   : > { %v1209_v1 = vpop.permute.xlu1 %1208  ;;  %3171 = vmatpush3.bf16.msra.mxu0 %v3453_v10 }
  0xdb   : > { %1223 = vst.msk [vmem:[#allocation2 + $0x8] sm:$0xff] %vm4902_vm15, %v1209_v1  ;;  %v541_v39 = vpop.permute.xlu0 %540  ;;  %3172 = vmatprep.subr.bf16.mxu0 %v3524_v55  ;;  %3209 = vmatpush3.bf16.msra.mxu1 %v3453_v10  ;;  %v2440_v1 = vshrl.u32 %v3433_v59, 16 }
  0xdc   : > { %2208 = vrot.lane.b32.xlu1 %v2192_v58, %s3519_s26  ;;  %552 = vst.msk [vmem:[#allocation2 + $0x20] sm:$0xff] %vm547_vm10, %v541_v39  ;;  %vm4903_vm10 = vmmov %vm4902_vm15  ;;  %v3434_v58 = vld [vmem:[%s3941_s14 + $0x18] sm:$0xff]   ;;  %3202 = vmatprep.subr.bf16.mxu1 %v3524_v55  ;;  %vm4905_vm15 = vcmask 162944  }
  0xdd   : > { %2204 = vrot.lane.b32.xlu0 %v2174_v2, %s3519_s26  ;;  %v2443_v2 = vshll.u32 %v3433_v59, 16  ;;  %v3455_v39 = vld [vmem:[%s4861_s3 + $0x38] sm:$0xff]   ;;  %v2422_v20 = vshrl.u32 %v3434_v58, 16  ;;  %v2425_v10 = vshll.u32 %v3434_v58, 16  ;;  %v2442_v9 = vrot.slane %v2440_v1, 2 }
  0xde   : > { %v1844_v24 = vpop.permute.xlu1 %1843  ;;  %3173 = vmatpush3.bf16.msra.mxu0 %v3454_v23  ;;  %v3440_v1 = vld [vmem:[%s3941_s14 + $0x28] ss:$0 sps:$4 sm:$0x11]  }
  0xdf   : > { %1859 = vst.msk [vmem:[#allocation2] sm:$0xff] %vm1858_vm6, %v1844_v24  ;;  %v1213_v41 = vpop.permute.xlu0 %1212  ;;  %3174 = vmatprep.subr.bf16.mxu0 %v3524_v55  ;;  %3210 = vmatpush3.bf16.msra.mxu1 %v3454_v23  ;;  %v2445_v59 = vrot.slane %v2443_v2, 3  ;;  %v2427_v58 = vrot.slane %v2425_v10, 3  ;;  %v3435_v10 = vld [vmem:[%s3941_s14 + $0x20] sm:$0xff]  }
  0xe0   : > { %1611 = vrot.lane.b32.xlu1 %v1602_v51, %s4893_s24  ;;  %1225 = vst.msk [vmem:[#allocation2 + $0x18] sm:$0xff] %vm4903_vm10, %v1213_v41  ;;  %v1785_v41 = vrot.slane %v3431_v37, 3  ;;  %3203 = vmatprep.subr.bf16.mxu1 %v3524_v55  ;;  %vm4906_vm10 = vcmask 425344  }
  0xe1   : > { %1607 = vrot.lane.b32.xlu0 %v4114_v8, %s4893_s24  ;;  %v2338_v8 = vrot.slane %v4514_v3, 2  ;;  %v4582_v11 = vor.u32 %v2445_v59, %v2442_v9  ;;  %v1923_v9 = vshrl.u32 %v4325_v15, 16 }
  0xe2   : > { %v612_v56 = vpop.permute.xlu1 %611  ;;  %3175 = vmatpush3.bf16.msra.mxu0 %v3455_v39 }
  0xe3   : > { %623 = vst.msk [vmem:[#allocation2 + $0x20] sm:$0xff] %vm618_vm11, %v612_v56  ;;  %v608_v19 = vpop.permute.xlu0 %607  ;;  %v2341_v24 = vsel %vm777_vm1, %v2338_v8, %v2340_v31  ;;  %v2337_v56 = vsel %vm777_vm1, %v2334_v34, %v2336_v60  ;;  %3211 = vmatpush3.bf16.msra.mxu1 %v3455_v39  ;;  %v2339_v53 = vsel %vm777_vm1, %v2336_v60, %v2338_v8 }
  0xe4   : > { %2279 = vrot.lane.b32.xlu1 %v2270_v40, %s4904_s11  ;;  %621 = vst.msk [vmem:[#allocation2 + $0x10] sm:$0xff] %vm618_vm11, %v608_v19  ;;  %v2436_v40 = vrot.slane %v2434_v32, 3  ;;  %vm4890_vm11 = vcmask 654944   ;;  %v4597_v32 = vld [vmem:[%s3941_s14 + $0x28] sm:$0xff]  }
  0xe5   : > { %2275 = vrot.lane.b32.xlu0 %v2266_v27, %s4904_s11  ;;  %v2424_v27 = vrot.slane %v2422_v20, 2 }
  0xe6   : > { %v1284_v51 = vpop.permute.xlu1 %1283  ;;  %v4580_v37 = vor.u32 %v2436_v40, %v2433_v18  ;;  %v3436_v18 = vld [vmem:[%s3941_s14 + $0x10] sm:$0xff]  }
  0xe7   : > { %1296 = vst.msk [vmem:[#allocation2 + $0x18] sm:$0xff] %vm1292_vm8, %v1284_v51  ;;  %v1280_v6 = vpop.permute.xlu0 %1279  ;;  %v4586_v36 = vor.u32 %v2427_v58, %v2424_v27  ;;  %v4607_v51 = vld [vmem:[%s3941_s14 + $0x18] sm:$0xff]   ;;  %v3443_v58 = vld [vmem:[%s3941_s14 + $0x2c] ss:$0 sps:$4 sm:$0x33]  }
  0xe8   : > { %1724 = vrot.lane.b32.xlu1 %v1715_v16, %s4895_s7  ;;  %1294 = vst.msk [vmem:[#allocation2 + $0x8] sm:$0xff] %vm1292_vm8, %v1280_v6  ;;  %v2447_v42 = vsel %vm920_vm5, %v4580_v37, %v4582_v11  ;;  %v2520_v40 = vrot.slane %v4607_v51, 3 }
  0xe9   : > { %1720 = vrot.lane.b32.xlu0 %v4184_v26, %s4895_s7  ;;  %v1786_v26 = vsel %vm1034_vm2, %v1783_v54, %v1785_v41  ;;  %v4594_v54 = vld [vmem:[%s3941_s14 + $0x20] sm:$0xff]   ;;  %v2429_v39 = vsel %vm920_vm5, %v4298_v52, %v4586_v36  ;;  %v1943_v41 = vshll.u32 %v3440_v1, 16  ;;  %v2194_v1 = vshrl.u32 %v3443_v58, 16 }
  0xea   : > { %v722_v23 = vpop.permute.xlu1 %721  ;;  %v2522_v6 = vrot.slane %v4594_v54, 3  ;;  %v2438_v3 = vsel %vm920_vm5, %v4586_v36, %v4580_v37 }
  0xeb   : > { %735 = vst.msk [vmem:[#allocation2 + $0x10] sm:$0xff] %vm4905_vm15, %v722_v23  ;;  %v1948_v19 = vpop.permute.xlu0 %1947  ;;  %vm2033_vm15 = vcmask 687744   ;;  %v3441_v23 = vld [vmem:[%s3941_s14 + $0x28] ss:$0 sps:$4 sm:$0x11]   ;;  %v1945_v27 = vrot.slane %v1943_v41, 1 }
  0xec   : > { %2350 = vrot.lane.b32.xlu1 %v2341_v24, %s3521_s22  ;;  %1963 = vst.msk [vmem:[#allocation2] sm:$0xff] %vm4890_vm11, %v1948_v19  ;;  %vm4907_vm11 = vcmask 162944   ;;  %v1939_v24 = vshrl.u32 %v4316_v43, 16  ;;  %v2521_v19 = vsel %vm1034_vm2, %v2518_v50, %v2520_v40  ;;  %v2523_v60 = vsel %vm1034_vm2, %v2520_v40, %v2522_v6 }
  0xed   : > { %2346 = vrot.lane.b32.xlu0 %v2337_v56, %s3521_s22 }
  0xee   : > { %v1351_v34 = vpop.permute.xlu1 %1350  ;;  %v1941_v56 = vor.u32 %v1939_v24, %v4341_v21 }
  0xef   : > { %1365 = vst.msk [vmem:[#allocation2 + $0x8] sm:$0xff] %vm4906_vm10, %v1351_v34  ;;  %v726_v16 = vpop.permute.xlu0 %725 }
  0xf0   : > { %1795 = vrot.lane.b32.xlu1 %v1786_v26, %s3512_s23  ;;  %737 = vst.msk [vmem:[#allocation2 + $0x20] sm:$0xff] %vm4907_vm11, %v726_v16  ;;  %vm4908_vm11 = vmmov %vm4906_vm10  ;;  %v1925_v26 = vor.u32 %v1923_v9, %v4351_v28  ;;  %v1946_v21 = vsel %vm415_vm3, %v1941_v56, %v1945_v27  ;;  %v2016_v16 = vrot.slane %v3441_v23, 1  ;;  %vm4909_vm10 = vcmask 490944   ;;  %v3447_v9 = vld [vmem:[%s3941_s14 + $0x30] ss:$0 sps:$4 sm:$0x77]  }
  0xf1   : > { %1791 = vrot.lane.b32.xlu0 %v4197_v5, %s3512_s23  ;;  %v2524_v5 = vrot.slane %v4597_v32, 3  ;;  %v2452_v23 = vshll.u32 %v3447_v9, 16  ;;  %s3216_s23 = smul.u32 10, %s4951_s15 }
  0xf2   : > { %v2019_v2 = vpop.permute.xlu1 %2018  ;;  %v1930_v25 = vsel %vm415_vm3, %v1925_v26, %v4333_v14  ;;  %v2017_v28 = vsel %vm520_vm0, %v2014_v35, %v2016_v16  ;;  %v2013_v14 = vsel %vm520_vm0, %v2010_v22, %v2012_v0  ;;  %vm2217_vm3 = vcmask 753344  }
  0xf3   : > { %2034 = vst.msk [vmem:[#allocation2] sm:$0xff] %vm2033_vm15, %v2019_v2  ;;  %v1355_v20 = vpop.permute.xlu0 %1354  ;;  %v2525_v43 = vsel %vm1034_vm2, %v2522_v6, %v2524_v5  ;;  %v2197_v2 = vshll.u32 %v3443_v58, 16  ;;  %v2454_v56 = vrot.slane %v2452_v23, 3  ;;  %v3449_v58 = vld [vmem:[%s3941_s14 + $0x30] ss:$0 sps:$4 sm:$0x77]  }
  0xf4   : > { %2463 = vrot.lane.b32.xlu1 %v2447_v42, %s3522_s29  ;;  %1367 = vst.msk [vmem:[#allocation2 + $0x18] sm:$0xff] %vm4908_vm11, %v1355_v20  ;;  %v3442_v42 = vld [vmem:[%s3941_s14 + $0x2c] ss:$0 sps:$4 sm:$0x11]   ;;  %vm4911_vm11 = vcmask 261344   ;;  %v2526_v57 = vrot.slane %v3449_v58, 3 }
  0xf5   : > { %2459 = vrot.lane.b32.xlu0 %v2429_v39, %s3522_s29  ;;  %v2087_v20 = vrot.slane %v3442_v42, 1  ;;  %v2199_v24 = vrot.slane %v2197_v2, 2 }
  0xf6   : > { %v798_v52 = vpop.permute.xlu1 %797  ;;  %v2527_v8 = vsel %vm1034_vm2, %v2524_v5, %v2526_v57  ;;  %vm2472_vm2 = vcmask 851744  }
  0xf7   : > { %809 = vst.msk [vmem:[#allocation2 + $0x20] sm:$0xff] %vm804_vm13, %v798_v52  ;;  %v794_v59 = vpop.permute.xlu0 %793  ;;  %v2088_v45 = vsel %vm520_vm0, %v2085_v48, %v2087_v20  ;;  %v3445_v48 = vld [vmem:[%s3941_s14 + $0x30] ss:$0 sps:$4 sm:$0x33]   ;;  %vm4912_vm0 = vmmov %vm4911_vm11 }
  0xf8   : > { %1851 = vrot.lane.b32.xlu1 %v3435_v10, %s3513_s10  ;;  %807 = vst.msk [vmem:[#allocation2 + $0x10] sm:$0xff] %vm804_vm13, %v794_v59  ;;  %vm2104_vm13 = vcmask 720544   ;;  %v2196_v10 = vrot.slane %v2194_v1, 1  ;;  %v2449_v59 = vshrl.u32 %v3447_v9, 16  ;;  %v2342_v13 = vrot.slane %v3445_v48, 2 }
  0xf9   : > { %1847 = vrot.lane.b32.xlu0 %v3436_v18, %s3513_s10  ;;  %v3444_v18 = vld [vmem:[%s3941_s14 + $0x2c] ss:$0 sps:$4 sm:$0x33]   ;;  %s3217_s14 = smul.u32 80, %s4945_s16 }
  0xfa   : > { %v1468_v15 = vpop.permute.xlu1 %1467  ;;  %v2200_v35 = vor.u32 %v2199_v24, %v2196_v10  ;;  %v2271_v47 = vrot.slane %v3444_v18, 2  ;;  %v2343_v17 = vsel %vm777_vm1, %v2340_v31, %v2342_v13 }
  0xfb   : > { %1480 = vst.msk [vmem:[#allocation2 + $0x18] sm:$0xff] %vm1476_vm9, %v1468_v15  ;;  %v1464_v34 = vpop.permute.xlu0 %1463  ;;  %s313_s10 = sadd.s32 %s3217_s14, %s3216_s23 }
  0xfc   : > { %2534 = vrot.lane.b32.xlu1 %v2525_v43, %s3523_s27  ;;  %1478 = vst.msk [vmem:[#allocation2 + $0x8] sm:$0xff] %vm1476_vm9, %v1464_v34  ;;  %v2201_v22 = vsel %vm663_vm4, %v4459_v29, %v2200_v35  ;;  %v2272_v30 = vsel %vm777_vm1, %v2269_v33, %v2271_v47  ;;  %v2451_v29 = vrot.slane %v2449_v59, 2  ;;  %vm2288_vm4 = vcmask 786144  }
  0xfd   : > { %2530 = vrot.lane.b32.xlu0 %v2521_v19, %s3523_s27  ;;  %vm2359_vm1 = vcmask 818944  }
  0xfe   : > { %v865_v39 = vpop.permute.xlu1 %864  ;;  %v2455_v33 = vor.u32 %v2454_v56, %v2451_v29 }
  0xff   : > { %878 = vst.msk [vmem:[#allocation2 + $0x10] sm:$0xff] %vm875_vm14, %v865_v39  ;;  %v2090_v50 = vpop.permute.xlu0 %2089 }
 0x100   : > { %1955 = vrot.lane.b32.xlu1 %v1946_v21, %s3514_s5  ;;  %2105 = vst.msk [vmem:[#allocation2] sm:$0xff] %vm2104_vm13, %v2090_v50  ;;  %v2456_v44 = vsel %vm920_vm5, %v4582_v11, %v2455_v33 }
 0x101   : > { %1951 = vrot.lane.b32.xlu0 %v1930_v25, %s3514_s5  ;;  %s2957_s5 = sshll.u32 %s313_s10, 2 }
 0x102   : > { %v1535_v41 = vpop.permute.xlu1 %1534 }
 0x103   : > { %1549 = vst.msk [vmem:[#allocation2 + $0x8] sm:$0xff] %vm4909_vm10, %v1535_v41  ;;  %v869_v52 = vpop.permute.xlu0 %868 }
 0x104   : > { %2026 = vrot.lane.b32.xlu1 %v2017_v28, %s3517_s6  ;;  %880 = vst.msk [vmem:[#allocation2 + $0x20] sm:$0xff] %vm875_vm14, %v869_v52  ;;  %vm4910_vm14 = vmmov %vm4909_vm10  ;;  %vm4913_vm10 = vcmask 294144  }
 0x105   : > { %2022 = vrot.lane.b32.xlu0 %v2013_v14, %s3517_s6 }
 0x106   : > { %v2203_v49 = vpop.permute.xlu1 %2202 }
 0x107   : > { %2218 = vst.msk [vmem:[#allocation2] sm:$0xff] %vm2217_vm3, %v2203_v49  ;;  %v1539_v0 = vpop.permute.xlu0 %1538 }
 0x108   : > { %2097 = vrot.lane.b32.xlu1 %v2088_v45, %s3518_s9  ;;  %1551 = vst.msk [vmem:[#allocation2 + $0x18] sm:$0xff] %vm4910_vm14, %v1539_v0  ;;  %vm4914_vm14 = vcmask 556544  }
 0x109   : > { %2093 = vrot.lane.b32.xlu0 %v2084_v12, %s3518_s9  ;;  %vm4916_vm5 = vmmov %vm4914_vm14 }
 0x10a   : > { %v983_v43 = vpop.permute.xlu1 %982 }
 0x10b   : > { %994 = vst.msk [vmem:[#allocation2 + $0x20] sm:$0xff] %vm4911_vm11, %v983_v43  ;;  %v979_v7 = vpop.permute.xlu0 %978  ;;  %vm4915_vm11 = vmmov %vm4913_vm10 }
 0x10c   : > { %2210 = vrot.lane.b32.xlu1 %v2201_v22, %s3519_s26  ;;  %992 = vst.msk [vmem:[#allocation2 + $0x10] sm:$0xff] %vm4912_vm0, %v979_v7  ;;  %vm4917_vm0 = vcmask 589344  }
 0x10d   : > { %2206 = vrot.lane.b32.xlu0 %v2183_v63, %s3519_s26  ;;  %s4817_s26 = scalar_lea.vmem %s4862_s4, %s2957_s5 }
 0x10e   : > { %v1610_v27 = vpop.permute.xlu1 %1609 }
 0x10f   : > { %1622 = vst.msk [vmem:[#allocation2 + $0x18] sm:$0xff] %vm1618_vm12, %v1610_v27  ;;  %v1606_v46 = vpop.permute.xlu0 %1605 }
 0x110   : > { %2281 = vrot.lane.b32.xlu1 %v2272_v30, %s4904_s11  ;;  %1620 = vst.msk [vmem:[#allocation2 + $0x8] sm:$0xff] %vm1618_vm12, %v1606_v46 }
 0x111   : > { %2277 = vrot.lane.b32.xlu0 %v2268_v38, %s4904_s11 }
 0x112   : > { %v1051_v15 = vpop.permute.xlu1 %1050 }
 0x113   : > { %1064 = vst.msk [vmem:[#allocation2 + $0x10] sm:$0xff] %vm4913_vm10, %v1051_v15  ;;  %v2274_v61 = vpop.permute.xlu0 %2273  ;;  %vm4918_vm10 = vmmov %vm4917_vm0 }
 0x114   : > { %2352 = vrot.lane.b32.xlu1 %v2343_v17, %s3521_s22  ;;  %2289 = vst.msk [vmem:[#allocation2] sm:$0xff] %vm2288_vm4, %v2274_v61 }
 0x115   : > { %2348 = vrot.lane.b32.xlu0 %v2339_v53, %s3521_s22 }
 0x116   : > { %v1719_v4 = vpop.permute.xlu1 %1718 }
 0x117   : > { %1733 = vst.msk [vmem:[#allocation2 + $0x8] sm:$0xff] %vm4914_vm14, %v1719_v4  ;;  %v1055_v62 = vpop.permute.xlu0 %1054  ;;  %vm4919_vm14 = vcmask 359744  }
 0x118   : > { %2465 = vrot.lane.b32.xlu1 %v2456_v44, %s3522_s29  ;;  %1066 = vst.msk [vmem:[#allocation2 + $0x20] sm:$0xff] %vm4915_vm11, %v1055_v62  ;;  %vm2543_vm11 = vcmask 884544  }
 0x119   : > { %2461 = vrot.lane.b32.xlu0 %v2438_v3, %s3522_s29 }
 0x11a   : > { %v2345_v31 = vpop.permute.xlu1 %2344 }
 0x11b   : > { %2360 = vst.msk [vmem:[#allocation2] sm:$0xff] %vm2359_vm1, %v2345_v31  ;;  %v1723_v37 = vpop.permute.xlu0 %1722 }
 0x11c   : > { %2536 = vrot.lane.b32.xlu1 %v2527_v8, %s3523_s27  ;;  %1735 = vst.msk [vmem:[#allocation2 + $0x18] sm:$0xff] %vm4916_vm5, %v1723_v37  ;;  %vm4920_vm5 = vmmov %vm4919_vm14 }
 0x11d   : > { %2532 = vrot.lane.b32.xlu0 %v2523_v60, %s3523_s27 }
 0x11e   : > { %v1111_v11 = vpop.permute.xlu1 %1110 }
 0x11f   : > { %1122 = vst.msk [vmem:[#allocation2 + $0x20] sm:$0xff] %vm1117_vm7, %v1111_v11  ;;  %v1107_v36 = vpop.permute.xlu0 %1106 }
 0x120   : > { %1120 = vst.msk [vmem:[#allocation2 + $0x10] sm:$0xff] %vm1117_vm7, %v1107_v36  ;;  %vm4921_vm7 = vcmask 654944  }
 0x122   : > { %v1794_v32 = vpop.permute.xlu1 %1793 }
 0x123   : > { %1806 = vst.msk [vmem:[#allocation2 + $0x18] sm:$0xff] %vm4917_vm0, %v1794_v32  ;;  %v1790_v54 = vpop.permute.xlu0 %1789  ;;  %vm4922_vm0 = vmmov 0  }
 0x124   : > { %1804 = vst.msk [vmem:[#allocation2 + $0x8] sm:$0xff] %vm4918_vm10, %v1790_v54  ;;  %vm4923_vm10 = vmmov %vm4921_vm7 }
 0x126   : > { %v1211_v51 = vpop.permute.xlu1 %1210 }
 0x127   : > { %1224 = vst.msk [vmem:[#allocation2 + $0x10] sm:$0xff] %vm4919_vm14, %v1211_v51  ;;  %v2458_v6 = vpop.permute.xlu0 %2457  ;;  %vm4924_vm14 = vcmask 425344  }
 0x128   : > { %2473 = vst.msk [vmem:[#allocation2] sm:$0xff] %vm2472_vm2, %v2458_v6 }
 0x12a   : > { %v1846_v5 = vpop.permute.xlu1 %1845 }
 0x12b   : > { %1860 = vst.msk [vmem:[#allocation2 + $0x8] sm:$0xff] %vm1858_vm6, %v1846_v5  ;;  %v1215_v40 = vpop.permute.xlu0 %1214 }
 0x12c   : > { %1226 = vst.msk [vmem:[#allocation2 + $0x20] sm:$0xff] %vm4920_vm5, %v1215_v40  ;;  %vm4925_vm5 = vmmov %vm4924_vm14 }
 0x12e   : > { %v2529_v19 = vpop.permute.xlu1 %2528 }
 0x12f   : > { %2544 = vst.msk [vmem:[#allocation2] sm:$0xff] %vm2543_vm11, %v2529_v19  ;;  %v1850_v26 = vpop.permute.xlu0 %1849 }
 0x130   : > { %1862 = vst.msk [vmem:[#allocation2 + $0x18] sm:$0xff] %vm1858_vm6, %v1850_v26 }
 0x132   : > { %v1286_v34 = vpop.permute.xlu1 %1285 }
 0x133   : > { %1297 = vst.msk [vmem:[#allocation2 + $0x20] sm:$0xff] %vm1292_vm8, %v1286_v34  ;;  %v1282_v21 = vpop.permute.xlu0 %1281 }
 0x134   : > { %1295 = vst.msk [vmem:[#allocation2 + $0x10] sm:$0xff] %vm1292_vm8, %v1282_v21  ;;  %vm4926_vm8 = vcmask 490944  }
 0x136   : > { %v1954_v16 = vpop.permute.xlu1 %1953  ;;  %v2549_v42 = vld [vmem:[#allocation2] sm:$0xff] }
 0x137   : > { %1966 = vst.msk [vmem:[#allocation2 + $0x18] sm:$0xff] %vm4921_vm7, %v1954_v16  ;;  %3177 = vmatmul.mubr.bf16.vlgmr.msra.gmra.mrb[0].mxu0 %v2549_v42  ;;  %v1950_v1 = vpop.permute.xlu0 %1949  ;;  %vm4927_vm7 = vmmov %vm4926_vm8 }
 0x138   : > { %3180 = vmatprep.mubr.msk.bf16.mxu0 %vm4922_vm0, %v3524_v55  ;;  %1964 = vst.msk [vmem:[#allocation2 + $0x8] sm:$0xff] %vm4923_vm10, %v1950_v1 }
 0x13a   : > { %v1357_v2 = vpop.permute.xlu1 %1356 }
 0x13b   : > { %1368 = vst.msk [vmem:[#allocation2 + $0x20] sm:$0xff] %vm4924_vm14, %v1357_v2  ;;  %v1353_v39 = vpop.permute.xlu0 %1352 }
 0x13c   : > { %1366 = vst.msk [vmem:[#allocation2 + $0x10] sm:$0xff] %vm4925_vm5, %v1353_v39  ;;  %vm4932_vm5 = vcmask 654944  }
 0x13e   : > { %v2025_v25 = vpop.permute.xlu1 %2024 }
 0x13f   : > { %2037 = vst.msk [vmem:[#allocation2 + $0x18] sm:$0xff] %vm2033_vm15, %v2025_v25  ;;  %v2021_v50 = vpop.permute.xlu0 %2020 }
 0x140   : > { %2035 = vst.msk [vmem:[#allocation2 + $0x8] sm:$0xff] %vm2033_vm15, %v2021_v50 }
 0x142   : > { %v1470_v28 = vpop.permute.xlu1 %1469 }
 0x143   : > { %1481 = vst.msk [vmem:[#allocation2 + $0x20] sm:$0xff] %vm1476_vm9, %v1470_v28  ;;  %v1466_v20 = vpop.permute.xlu0 %1465 }
 0x144   : > { %1479 = vst.msk [vmem:[#allocation2 + $0x10] sm:$0xff] %vm1476_vm9, %v1466_v20  ;;  %vm4928_vm9 = vcmask 556544  }
 0x145   : > { %vm4929_vm10 = vmmov %vm4928_vm9 }
 0x146   : > { %v2096_v10 = vpop.permute.xlu1 %2095 }
 0x147   : > { %2108 = vst.msk [vmem:[#allocation2 + $0x18] sm:$0xff] %vm2104_vm13, %v2096_v10  ;;  %v2092_v24 = vpop.permute.xlu0 %2091 }
 0x148   : > { %2106 = vst.msk [vmem:[#allocation2 + $0x8] sm:$0xff] %vm2104_vm13, %v2092_v24 }
 0x14a   : > { %v1541_v41 = vpop.permute.xlu1 %1540 }
 0x14b   : > { %1552 = vst.msk [vmem:[#allocation2 + $0x20] sm:$0xff] %vm4926_vm8, %v1541_v41  ;;  %v1537_v14 = vpop.permute.xlu0 %1536  ;;  %vm4933_vm8 = vmmov %vm4932_vm5 }
 0x14c   : > { %1550 = vst.msk [vmem:[#allocation2 + $0x10] sm:$0xff] %vm4927_vm7, %v1537_v14 }
 0x14e   : > { %v2209_v52 = vpop.permute.xlu1 %2208 }
 0x14f   : > { %2221 = vst.msk [vmem:[#allocation2 + $0x18] sm:$0xff] %vm2217_vm3, %v2209_v52  ;;  %v2205_v45 = vpop.permute.xlu0 %2204 }
 0x150   : > { %2219 = vst.msk [vmem:[#allocation2 + $0x8] sm:$0xff] %vm2217_vm3, %v2205_v45 }
 0x152   : > { %v1612_v35 = vpop.permute.xlu1 %1611 }
 0x153   : > { %1623 = vst.msk [vmem:[#allocation2 + $0x20] sm:$0xff] %vm1618_vm12, %v1612_v35  ;;  %v1608_v18 = vpop.permute.xlu0 %1607 }
 0x154   : > { %1621 = vst.msk [vmem:[#allocation2 + $0x10] sm:$0xff] %vm1618_vm12, %v1608_v18  ;;  %vm4930_vm12 = vcmask 589344  }
 0x155   : > { %vm4931_vm14 = vmmov %vm4930_vm12 }
 0x156   : > { %v2280_v9 = vpop.permute.xlu1 %2279 }
 0x157   : > { %2292 = vst.msk [vmem:[#allocation2 + $0x18] sm:$0xff] %vm2288_vm4, %v2280_v9  ;;  %v2276_v49 = vpop.permute.xlu0 %2275 }
 0x158   : > { %2290 = vst.msk [vmem:[#allocation2 + $0x8] sm:$0xff] %vm2288_vm4, %v2276_v49 }
 0x15a   : > { %v1725_v12 = vpop.permute.xlu1 %1724 }
 0x15b   : > { %1736 = vst.msk [vmem:[#allocation2 + $0x20] sm:$0xff] %vm4928_vm9, %v1725_v12  ;;  %v1721_v0 = vpop.permute.xlu0 %1720 }
 0x15c   : > { %1734 = vst.msk [vmem:[#allocation2 + $0x10] sm:$0xff] %vm4929_vm10, %v1721_v0 }
 0x15e   : > { %v2351_v22 = vpop.permute.xlu1 %2350 }
 0x15f   : > { %2363 = vst.msk [vmem:[#allocation2 + $0x18] sm:$0xff] %vm2359_vm1, %v2351_v22  ;;  %v2347_v47 = vpop.permute.xlu0 %2346 }
 0x160   : > { %2361 = vst.msk [vmem:[#allocation2 + $0x8] sm:$0xff] %vm2359_vm1, %v2347_v47 }
 0x162   : > { %v1796_v48 = vpop.permute.xlu1 %1795 }
 0x163   : > { %1807 = vst.msk [vmem:[#allocation2 + $0x20] sm:$0xff] %vm4930_vm12, %v1796_v48  ;;  %v1792_v59 = vpop.permute.xlu0 %1791 }
 0x164   : > { %1805 = vst.msk [vmem:[#allocation2 + $0x10] sm:$0xff] %vm4931_vm14, %v1792_v59 }
 0x166   : > { %v2464_v23 = vpop.permute.xlu1 %2463 }
 0x167   : > { %2476 = vst.msk [vmem:[#allocation2 + $0x18] sm:$0xff] %vm2472_vm2, %v2464_v23  ;;  %v2460_v43 = vpop.permute.xlu0 %2459 }
 0x168   : > { %2474 = vst.msk [vmem:[#allocation2 + $0x8] sm:$0xff] %vm2472_vm2, %v2460_v43 }
 0x16a   : > { %v1852_v63 = vpop.permute.xlu1 %1851 }
 0x16b   : > { %1863 = vst.msk [vmem:[#allocation2 + $0x20] sm:$0xff] %vm1858_vm6, %v1852_v63  ;;  %v1848_v7 = vpop.permute.xlu0 %1847 }
 0x16c   : > { %1861 = vst.msk [vmem:[#allocation2 + $0x10] sm:$0xff] %vm1858_vm6, %v1848_v7  ;;  %vm2801_vm6 = vcmask 27648  }
 0x16e   : > { %v2535_v30 = vpop.permute.xlu1 %2534 }
 0x16f   : > { %2547 = vst.msk [vmem:[#allocation2 + $0x18] sm:$0xff] %vm2543_vm11, %v2535_v30  ;;  %v2531_v13 = vpop.permute.xlu0 %2530 }
 0x170   : > { %2545 = vst.msk [vmem:[#allocation2 + $0x8] sm:$0xff] %vm2543_vm11, %v2531_v13 }
 0x172   : > { %v1956_v29 = vpop.permute.xlu1 %1955 }
 0x173   : > { %1967 = vst.msk [vmem:[#allocation2 + $0x20] sm:$0xff] %vm4932_vm5, %v1956_v29  ;;  %v1952_v56 = vpop.permute.xlu0 %1951 }
 0x174   : > { %1965 = vst.msk [vmem:[#allocation2 + $0x10] sm:$0xff] %vm4933_vm8, %v1952_v56 }
 0x176   : > { %v2027_v27 = vpop.permute.xlu1 %2026  ;;  %v2552_v38 = vld [vmem:[#allocation2 + $0x18] sm:$0xff] }
 0x177   : > { %2038 = vst.msk [vmem:[#allocation2 + $0x20] sm:$0xff] %vm2033_vm15, %v2027_v27  ;;  %3189 = vmatmul.mubr.bf16.vlgmr.msra.gmra.mrb[0].mxu1 %v2552_v38  ;;  %v2023_v46 = vpop.permute.xlu0 %2022  ;;  %v2550_v17 = vld [vmem:[#allocation2 + $0x8] sm:$0xff] }
 0x178   : > { %3192 = vmatprep.mubr.msk.bf16.mxu1 %vm4922_vm0, %v3524_v55  ;;  %2036 = vst.msk [vmem:[#allocation2 + $0x10] sm:$0xff] %vm2033_vm15, %v2023_v46  ;;  %3181 = vmatmul.mubr.bf16.gmra.mrb[4].mxu0 %v2550_v17 }
 0x179   : > { %3184 = vmatprep.mubr.msk.bf16.mxu0 %vm4922_vm0, %v3524_v55 }
 0x17a   : > { %v2098_v33 = vpop.permute.xlu1 %2097 }
 0x17b   : > { %2109 = vst.msk [vmem:[#allocation2 + $0x20] sm:$0xff] %vm2104_vm13, %v2098_v33  ;;  %v2094_v58 = vpop.permute.xlu0 %2093 }
 0x17c   : > { %2107 = vst.msk [vmem:[#allocation2 + $0x10] sm:$0xff] %vm2104_vm13, %v2094_v58 }
 0x17e   : > { %v2211_v15 = vpop.permute.xlu1 %2210 }
 0x17f   : > { %2222 = vst.msk [vmem:[#allocation2 + $0x20] sm:$0xff] %vm2217_vm3, %v2211_v15  ;;  %v2207_v53 = vpop.permute.xlu0 %2206 }
 0x180   : > { %2220 = vst.msk [vmem:[#allocation2 + $0x10] sm:$0xff] %vm2217_vm3, %v2207_v53 }
 0x182   : > { %v2282_v61 = vpop.permute.xlu1 %2281 }
 0x183   : > { %2293 = vst.msk [vmem:[#allocation2 + $0x20] sm:$0xff] %vm2288_vm4, %v2282_v61  ;;  %v2278_v44 = vpop.permute.xlu0 %2277 }
 0x184   : > { %2291 = vst.msk [vmem:[#allocation2 + $0x10] sm:$0xff] %vm2288_vm4, %v2278_v44 }
 0x186   : > { %v2353_v57 = vpop.permute.xlu1 %2352 }
 0x187   : > { %2364 = vst.msk [vmem:[#allocation2 + $0x20] sm:$0xff] %vm2359_vm1, %v2353_v57  ;;  %v2349_v55 = vpop.permute.xlu0 %2348 }
 0x188   : > { %2362 = vst.msk [vmem:[#allocation2 + $0x10] sm:$0xff] %vm2359_vm1, %v2349_v55 }
 0x18a   : > { %v2466_v4 = vpop.permute.xlu1 %2465 }
 0x18b   : > { %2477 = vst.msk [vmem:[#allocation2 + $0x20] sm:$0xff] %vm2472_vm2, %v2466_v4  ;;  %v2462_v3 = vpop.permute.xlu0 %2461 }
 0x18c   : > { %2475 = vst.msk [vmem:[#allocation2 + $0x10] sm:$0xff] %vm2472_vm2, %v2462_v3 }
 0x18e   : > { %v2537_v62 = vpop.permute.xlu1 %2536 }
 0x18f   : > { %2548 = vst.msk [vmem:[#allocation2 + $0x20] sm:$0xff] %vm2543_vm11, %v2537_v62  ;;  %v2533_v8 = vpop.permute.xlu0 %2532 }
 0x190   : > { %2546 = vst.msk [vmem:[#allocation2 + $0x10] sm:$0xff] %vm2543_vm11, %v2533_v8 }
 0x196   : > { %v2553_v31 = vld [vmem:[#allocation2 + $0x20] sm:$0xff] }
 0x197   : > { %3193 = vmatmul.mubr.bf16.gmra.mrb[4].mxu1 %v2553_v31  ;;  %v2551_v60 = vld [vmem:[#allocation2 + $0x10] sm:$0xff] }
 0x198   : > { %3185 = vmatmul.mubr.bf16.gmra.mrb[8].mxu0 %v2551_v60 }
 0x20a   : > { %v2652_v37 = vpop.f32.mrb[0].mxu0 }
 0x20b   : > { %2721 = vrot.lane.b32.xlu0 %v2652_v37, %s3526_s25  ;;  %v3178_v11 = vpop.f32.mrb[1].mxu0  ;;  %v2691_v28 = vmul.f32 0.01, %v2652_v37 }
 0x20c   : > { %v2655_v36 = vpop.f32.mrb[2].mxu0 }
 0x20d   : > { %2723 = vrot.lane.b32.xlu1 %v2655_v36, %s3526_s25  ;;  %v3179_v32 = vpop.f32.mrb[3].mxu0  ;;  %v2692_v20 = vmul.f32 0.01, %v2655_v36  ;;  %v2701_v10 = vmax.f32 %v2652_v37, %v2691_v28 }
 0x20f   : > { %v2702_v14 = vmax.f32 %v2655_v36, %v2692_v20 }
 0x24a   : > { %v2676_v54 = vpop.f32.mrb[0].mxu1 }
 0x24b   : > { %v3190_v51 = vpop.f32.mrb[1].mxu1  ;;  %2733 = vrot.lane.b32.xlu0 %v2676_v54, %s3526_s25  ;;  %v2660_v6 = vpop.f32.mrb[4].mxu0  ;;  %v2697_v9 = vmul.f32 0.01, %v2676_v54 }
 0x24c   : > { %v2679_v5 = vpop.f32.mrb[2].mxu1  ;;  %v3182_v40 = vpop.f32.mrb[5].mxu0  ;;  %v2693_v12 = vmul.f32 0.01, %v2660_v6 }
 0x24d   : > { %2735 = vrot.lane.b32.xlu1 %v2679_v5, %s3526_s25  ;;  %v3191_v19 = vpop.f32.mrb[3].mxu1  ;;  %v2663_v26 = vpop.f32.mrb[6].mxu0  ;;  %v2698_v49 = vmul.f32 0.01, %v2679_v5  ;;  %v2707_v0 = vmax.f32 %v2676_v54, %v2697_v9 }
 0x24e   : > { %v3183_v34 = vpop.f32.mrb[7].mxu0  ;;  %v2694_v47 = vmul.f32 0.01, %v2663_v26  ;;  %v2703_v7 = vmax.f32 %v2660_v6, %v2693_v12 }
 0x24f   : > { %2725 = vrot.lane.b32.xlu0 %v2660_v6, %s3526_s25  ;;  %v2708_v59 = vmax.f32 %v2679_v5, %v2698_v49 }
 0x250   : > { %v2704_v56 = vmax.f32 %v2663_v26, %v2694_v47 }
 0x251   : > { %2727 = vrot.lane.b32.xlu1 %v2663_v26, %s3526_s25 }
 0x26a   : > { %v4801_v21 = vpop.f32.mrb[4].mxu1 }
 0x26b   : > { %v3194_v16 = vpop.f32.mrb[5].mxu1  ;;  %v2668_v42 = vpop.f32.mrb[8].mxu0  ;;  %v2699_v15 = vmul.f32 0.01, %v4801_v21 }
 0x26c   : > { %v4803_v1 = vpop.f32.mrb[6].mxu1  ;;  %2729 = vrot.lane.b32.xlu0 %v2668_v42, %s3526_s25  ;;  %v3186_v2 = vpop.f32.mrb[9].mxu0  ;;  %v2695_v33 = vmul.f32 0.01, %v2668_v42 }
 0x26d   : > { %v3195_v39 = vpop.f32.mrb[7].mxu1  ;;  %v2671_v25 = vpop.f32.mrb[10].mxu0  ;;  %v2700_v44 = vmul.f32 0.01, %v4803_v1  ;;  %v2709_v8 = vmax.f32 %v4801_v21, %v2699_v15 }
 0x26e   : > { %2731 = vrot.lane.b32.xlu1 %v2671_v25, %s3526_s25  ;;  %v3187_v50 = vpop.f32.mrb[11].mxu0  ;;  %v2696_v58 = vmul.f32 0.01, %v2671_v25  ;;  %v2705_v53 = vmax.f32 %v2668_v42, %v2695_v33 }
 0x26f   : > { %v2710_v11 = vmax.f32 %v4803_v1, %v2700_v44 }
 0x270   : > { %2737 = vrot.lane.b32.xlu0 %v4801_v21, %s3526_s25  ;;  %v2706_v55 = vmax.f32 %v2671_v25, %v2696_v58 }
 0x272   : > { %2739 = vrot.lane.b32.xlu1 %v4803_v1, %s3526_s25 }
 0x27d   : > { %v2722_v24 = vpop.permute.xlu0 %2721 }
 0x27e   : > { %v2751_v41 = vadd.f32 %v2722_v24, %v2701_v10 }
 0x27f   : > { %v2724_v52 = vpop.permute.xlu1 %2723 }
 0x280   : > { %v3137_v45 = vpack.c.bf16 %v2751_v41, %v2751_v41  ;;  %v2752_v35 = vadd.f32 %v2724_v52, %v2702_v14 }
 0x282   : > { %2802 = vst.msk [vmem:[%s4817_s26] sm:$0xf] %vm2801_vm6, %v3137_v45  ;;  %v3138_v18 = vpack.c.bf16 %v2752_v35, %v2752_v35 }
 0x284   : > { %2803 = vst.msk [vmem:[%s4817_s26 + $0x4] sm:$0xf] %vm2801_vm6, %v3138_v18 }
 0x2bd   : > { %v2734_v22 = vpop.permute.xlu0 %2733 }
 0x2be   : > { %v2757_v48 = vadd.f32 %v2734_v22, %v2707_v0 }
 0x2bf   : > { %v2736_v23 = vpop.permute.xlu1 %2735 }
 0x2c0   : > { %v3143_v43 = vpack.c.bf16 %v2757_v48, %v2757_v48  ;;  %v2758_v63 = vadd.f32 %v2736_v23, %v2708_v59 }
 0x2c1   : > { %v2726_v30 = vpop.permute.xlu0 %2725 }
 0x2c2   : > { %2808 = vst.msk [vmem:[%s4817_s26 + $0x18] sm:$0xf] %vm2801_vm6, %v3143_v43  ;;  %v3144_v13 = vpack.c.bf16 %v2758_v63, %v2758_v63  ;;  %v2753_v29 = vadd.f32 %v2726_v30, %v2703_v7 }
 0x2c3   : > { %v2728_v27 = vpop.permute.xlu1 %2727 }
 0x2c4   : > { %2809 = vst.msk [vmem:[%s4817_s26 + $0x1c] sm:$0xf] %vm2801_vm6, %v3144_v13  ;;  %v3139_v38 = vpack.c.bf16 %v2753_v29, %v2753_v29  ;;  %v2754_v46 = vadd.f32 %v2728_v27, %v2704_v56 }
 0x2c6   : > { %2804 = vst.msk [vmem:[%s4817_s26 + $0x8] sm:$0xf] %vm2801_vm6, %v3139_v38  ;;  %v3140_v17 = vpack.c.bf16 %v2754_v46, %v2754_v46 }
 0x2c8   : > { %2805 = vst.msk [vmem:[%s4817_s26 + $0xc] sm:$0xf] %vm2801_vm6, %v3140_v17 }
 0x2de   : > { %v2730_v61 = vpop.permute.xlu0 %2729 }
 0x2df   : > { %v2755_v57 = vadd.f32 %v2730_v61, %v2705_v53 }
 0x2e0   : > { %v2732_v4 = vpop.permute.xlu1 %2731 }
 0x2e1   : > { %v3141_v3 = vpack.c.bf16 %v2755_v57, %v2755_v57  ;;  %v2756_v62 = vadd.f32 %v2732_v4, %v2706_v55 }
 0x2e2   : > { %v2738_v31 = vpop.permute.xlu0 %2737 }
 0x2e3   : > { %2806 = vst.msk [vmem:[%s4817_s26 + $0x10] sm:$0xf] %vm2801_vm6, %v3141_v3  ;;  %v3142_v60 = vpack.c.bf16 %v2756_v62, %v2756_v62  ;;  %v2759_v37 = vadd.f32 %v2738_v31, %v2709_v8 }
 0x2e4   : > { %v2740_v36 = vpop.permute.xlu1 %2739 }
 0x2e5   : > { %2807 = vst.msk [vmem:[%s4817_s26 + $0x14] sm:$0xf] %vm2801_vm6, %v3142_v60  ;;  %v3145_v32 = vpack.c.bf16 %v2759_v37, %v2759_v37  ;;  %v2760_v54 = vadd.f32 %v2740_v36, %v2710_v11 }
 0x2e7   : > { %2810 = vst.msk [vmem:[%s4817_s26 + $0x20] sm:$0xf] %vm2801_vm6, %v3145_v32  ;;  %v3146_v51 = vpack.c.bf16 %v2760_v54, %v2760_v54 }
 0x2e9   : > { %2811 = vst.msk [vmem:[%s4817_s26 + $0x24] sm:$0xf] %vm2801_vm6, %v3146_v51 }
 0x2ea PF: > { %s14_s19 = sadd.s32 1, %s3494_s19   ;;  %s4934_s15 = smov %s3486_s17 }
 0x2eb   : > { %p11_p10 = scmp.ge.s32.totalorder %s14_s19, 18   ;;  %s4935_s16 = smov %s3490_s18 }
 0x2ec   : > { %s4936_s17 = smov %s4939_s20  ;;  %s4937_s18 = smov %s4943_s21 }
 0x2ed   :  { %13 = sbr.rel (!%p11_p10) target bundleno = 3 (0x3), region = 72 }

</bundles_post_ra>
